<compile_context>
chip_gen: v6e
topology: v6e:2x2x1
jax: 0.10.0
libtpu: 0.0.40
codegen_flags: <defaults>
</compile_context>

<pallas_src>
import jax
import jax.numpy as jnp
from jax import lax
from jax.experimental import pallas as pl
from jax.experimental.pallas import tpu as pltpu


def _label_decoder_kernel(w_ref, l_ref, r_ref, ee_ref, eo_ref, oe_ref, oo_ref, o_ref):
    # w_ref : SMEM (C*9 + 1,) f32 -- BN-scaled conv weights (c-major, then ky,kx)
    #                                followed by the folded shift scalar.
    # l_ref : VMEM (Ht, Ho) f32 0/1 vertical nearest-replication matrix.
    # r_ref : VMEM (Wo, Wt) f32 0/1 horizontal nearest-replication matrix.
    # ee/eo/oe/oo_ref : VMEM (bn, C, Ho+1, Wo+1) bf16 polyphase slabs.
    # o_ref : VMEM (bn, Ht, Wt) f32 fully-upsampled conv+BN+ReLU output.
    bn, C, Hp, Wp = ee_ref.shape
    H_out, W_out = Hp - 1, Wp - 1
    Ht, Wt = o_ref.shape[1], o_ref.shape[2]

    # tap t = ky*3+kx  ->  (polyphase slab, row offset, col offset)
    taps = (
        (0, 0, 0), (1, 0, 0), (0, 0, 1),   # ky = 0 : kx = 0, 1, 2
        (2, 0, 0), (3, 0, 0), (2, 0, 1),   # ky = 1
        (0, 1, 0), (1, 1, 0), (0, 1, 1),   # ky = 2
    )
    srcs = (ee_ref, eo_ref, oe_ref, oo_ref)

    # Four independent accumulators -> four short dependency chains on the VPU.
    n_acc = 4
    accs = [jnp.zeros((bn, H_out, W_out), jnp.float32) for _ in range(n_acc)]
    for c in range(C):
        # Upcast only the per-channel slice (4 small f32 slabs live at a time).
        ch = [srcs[s][:, c, :, :].astype(jnp.float32) for s in range(4)]
        for t, (s, dy, dx) in enumerate(taps):
            w_ct = w_ref[c * 9 + t]
            accs[t % n_acc] = (
                accs[t % n_acc] + w_ct * ch[s][:, dy:dy + H_out, dx:dx + W_out]
            )

    shift = w_ref[9 * C]                    # a*(conv_bias - mean) + beta
    small = jnp.maximum((accs[0] + accs[1]) + (accs[2] + accs[3]) + shift, 0.0)

    # Fused nearest-neighbour upsample on the (otherwise idle) MXU:
    #   full[b, T, X] = sum_{h,w} L[T,h] * small[b,h,w] * R[w,X]
    wide = lax.dot_general(small, r_ref[...], (((2,), (0,)), ((), ())),
                           preferred_element_type=jnp.float32)        # (bn, Ho, Wt)
    lb = jnp.broadcast_to(l_ref[...], (bn, Ht, H_out))
    full = lax.dot_general(lb, wide, (((2,), (1,)), ((0,), (0,))),
                           preferred_element_type=jnp.float32)        # (bn, Ht, Wt)
    o_ref[...] = full.astype(o_ref.dtype)


def _round_up(x, m):
    return ((x + m - 1) // m) * m


def _tile_bytes(h, w, sublane, itemsize):
    return _round_up(max(int(h), 1), sublane) * _round_up(max(int(w), 1), 128) * itemsize


def _pick_batch_tile(N, C, Hp, Wp, H_out, W_out, Ht, Wt):
    """Largest batch tile whose tile-padding-aware VMEM footprint fits a
    conservative per-step budget, keeping >=4 grid steps when N allows."""
    bf16 = lambda h, w: _tile_bytes(h, w, 16, 2)
    f32 = lambda h, w: _tile_bytes(h, w, 8, 4)
    per_img = (
        4 * C * bf16(Hp, Wp) * 2        # four bf16 polyphase slabs, double-buffered
        + 4 * f32(Hp, Wp)               # per-channel f32 upcasts live in the MAC loop
        + 4 * f32(H_out, W_out)         # four f32 accumulators
        + f32(H_out, Wt)                # horizontal-upsample intermediate
        + f32(Ht, H_out)                # broadcast vertical replication matrix
        + 2 * f32(Ht, Wt)               # f32 output block, double-buffered
    )
    fixed = 2 * (f32(Ht, H_out) + f32(W_out, Wt))     # resident L / R blocks
    budget = 6 * 1024 * 1024 - fixed
    cap_mem = max(1, budget // max(per_img, 1))
    min_steps = min(N, 4)               # >=4 steps when N allows (v7x: 2 TCs + ramp)
    cap_steps = max(1, N // min_steps)
    return int(max(1, min(N, cap_mem, cap_steps)))


def label_decoder_forward(mask_enc, original_shape, params):
    """mask_enc: (..., C, H, W) float32. Returns (prod(leading), 1, *original_shape) f32."""
    C, H, W = mask_enc.shape[-3:]
    N = 1
    for d in mask_enc.shape[:-3]:
        N *= d
    x = mask_enc.reshape(N, C, H, W)

    # conv output size for k=3, stride=2, pad=1
    H_out = (H + 2 - 3) // 2 + 1
    W_out = (W + 2 - 3) // 2 + 1
    Hp, Wp = H_out + 1, W_out + 1
    Ht, Wt = int(original_shape[0]), int(original_shape[1])

    bn = _pick_batch_tile(N, C, Hp, Wp, H_out, W_out, Ht, Wt)
    Npad = -(-N // bn) * bn
    if Npad != N:                        # ragged batch: pad instead of bn=1 fallback
        x = jnp.pad(x, ((0, Npad - N), (0, 0), (0, 0), (0, 0)))

    # --- glue: bf16 cast, zero pad to exactly (2*Hp, 2*Wp), polyphase split.
    # TODO(synk): this producer is one extra HBM pass over the input; it could
    # be folded into the kernel with in-kernel stride-2 slices if it shows up.
    xb = x.astype(jnp.bfloat16)
    xp = jnp.pad(xb, ((0, 0), (0, 0),
                      (1, 2 * H_out - H + 1), (1, 2 * W_out - W + 1)))
    ee = xp[:, :, 0::2, 0::2]            # all four slabs: (Npad, C, Hp, Wp)
    eo = xp[:, :, 0::2, 1::2]
    oe = xp[:, :, 1::2, 0::2]
    oo = xp[:, :, 1::2, 1::2]

    # --- glue: fold conv bias + eval-mode BN into scaled weights + one shift.
    a = (params["gamma"][0] /
         jnp.sqrt(params["running_var"][0] + params["eps"])).astype(jnp.float32)
    w_scaled = (a * params["weight"].astype(jnp.float32)).reshape(C * 9)
    shift = (a * (params["bias"][0].astype(jnp.float32) - params["running_mean"][0])
             + params["beta"][0])
    wvec = jnp.concatenate([w_scaled, jnp.reshape(shift, (1,)).astype(jnp.float32)])

    # --- glue: exact nearest-neighbour replication matrices (F.interpolate).
    ih = (jnp.arange(Ht) * H_out) // Ht
    L = (ih[:, None] == jnp.arange(H_out)[None, :]).astype(jnp.float32)   # (Ht, Ho)
    iw = (jnp.arange(Wt) * W_out) // Wt
    R = (jnp.arange(W_out)[:, None] == iw[None, :]).astype(jnp.float32)   # (Wo, Wt)

    grid = (Npad // bn,)
    out = pl.pallas_call(
        _label_decoder_kernel,
        out_shape=jax.ShapeDtypeStruct((Npad, Ht, Wt), jnp.float32),
        grid=grid,
        in_specs=[
            pl.BlockSpec(memory_space=pltpu.MemorySpace.SMEM),              # weights+shift
            pl.BlockSpec((Ht, H_out), lambda i: (0, 0)),                    # L (resident)
            pl.BlockSpec((W_out, Wt), lambda i: (0, 0)),                    # R (resident)
            pl.BlockSpec((bn, C, Hp, Wp), lambda i: (i, 0, 0, 0)),          # even/even
            pl.BlockSpec((bn, C, Hp, Wp), lambda i: (i, 0, 0, 0)),          # even/odd
            pl.BlockSpec((bn, C, Hp, Wp), lambda i: (i, 0, 0, 0)),          # odd/even
            pl.BlockSpec((bn, C, Hp, Wp), lambda i: (i, 0, 0, 0)),          # odd/odd
        ],
        out_specs=pl.BlockSpec((bn, Ht, Wt), lambda i: (i, 0, 0)),
        compiler_params=pltpu.CompilerParams(
            dimension_semantics=("parallel",),
            vmem_limit_bytes=32 * 1024 * 1024,
        ),
    )(wvec, L, R, ee, eo, oe, oo)

    return out[:N].reshape(N, 1, Ht, Wt)


def _reference(mask_enc, original_shape, params):
    """Pure-JAX reference mirroring the PyTorch forward (eval-mode BN)."""
    C, H, W = mask_enc.shape[-3:]
    x = mask_enc.reshape((-1, C, H, W)).astype(jnp.float32)
    z = lax.conv_general_dilated(
        x, params["weight"].astype(jnp.float32),
        window_strides=(2, 2), padding=((1, 1), (1, 1)),
        dimension_numbers=("NCHW", "OIHW", "NCHW"))
    z = z + params["bias"].reshape(1, -1, 1, 1)
    a = params["gamma"] / jnp.sqrt(params["running_var"] + params["eps"])
    z = (a.reshape(1, -1, 1, 1) * (z - params["running_mean"].reshape(1, -1, 1, 1))
         + params["beta"].reshape(1, -1, 1, 1))
    z = jnp.maximum(z, 0.0)
    H_out, W_out = z.shape[2], z.shape[3]
    Ht, Wt = original_shape
    ih = (jnp.arange(Ht) * H_out) // Ht
    iw = (jnp.arange(Wt) * W_out) // Wt
    return z[:, :, ih[:, None], iw[None, :]]


if __name__ == "__main__":
    key = jax.random.PRNGKey(0)
    k_x, k_w, k_b = jax.random.split(key, 3)

    # small shapes consistent with forward: mask_enc (T, B, C, H, W), layer_dim = C
    T, B, C, H, W = 2, 2, 8, 16, 16
    original_shape = (16, 16)
    mask_enc = jax.random.normal(k_x, (T, B, C, H, W), jnp.float32)

    fan_in = C * 3 * 3
    params = dict(
        weight=jax.random.normal(k_w, (1, C, 3, 3), jnp.float32) * (2.0 / fan_in) ** 0.5,
        bias=jax.random.normal(k_b, (1,), jnp.float32) * 0.1,
        gamma=jnp.full((1,), 1.5, jnp.float32),
        beta=jnp.full((1,), 0.1, jnp.float32),
        running_mean=jnp.full((1,), 0.05, jnp.float32),
        running_var=jnp.full((1,), 0.9, jnp.float32),
        eps=jnp.float32(1e-5),
    )

    fwd = jax.jit(label_decoder_forward, static_argnums=1)
    out = jax.block_until_ready(fwd(mask_enc, original_shape, params))
    assert out.shape == (T * B, 1) + original_shape, out.shape

    ref = jax.block_until_ready(_reference(mask_enc, original_shape, params))
    max_err = float(jnp.max(jnp.abs(out - ref)))
    scale = float(jnp.max(jnp.abs(ref))) + 1e-6
    assert max_err < 2e-2 + 2e-2 * scale, f"mismatch vs reference (bf16 inputs): {max_err}"

    print("KERNEL_OK")
</pallas_src>

<mosaic_0001>
module attributes {stable_mosaic.version = 11 : i64} {
  func.func @_label_decoder_kernel(%arg0: i32, %arg1: memref<73xf32, #tpu.memory_space<smem>>, %arg2: memref<16x8xf32, #tpu.memory_space<vmem>>, %arg3: memref<8x16xf32, #tpu.memory_space<vmem>>, %arg4: memref<1x8x9x9xbf16, #tpu.memory_space<vmem>>, %arg5: memref<1x8x9x9xbf16, #tpu.memory_space<vmem>>, %arg6: memref<1x8x9x9xbf16, #tpu.memory_space<vmem>>, %arg7: memref<1x8x9x9xbf16, #tpu.memory_space<vmem>>, %arg8: memref<1x16x16xf32, #tpu.memory_space<vmem>>) attributes {dimension_semantics = [#tpu.dimension_semantics<parallel>], iteration_bounds = array<i64: 4>, scalar_prefetch = 0 : i64, scratch_operands = 0 : i64, tpu.core_type = #tpu.core_type<tc>, window_params = [{transform_indices = @transform_0, window_bounds = array<i64: 73>}, {pipeline_mode = #tpu.pipeline_mode<synchronous>, transform_indices = @transform_1, window_bounds = array<i64: 16, 8>}, {pipeline_mode = #tpu.pipeline_mode<synchronous>, transform_indices = @transform_2, window_bounds = array<i64: 8, 16>}, {transform_indices = @transform_3, window_bounds = array<i64: 1, 8, 9, 9>}, {transform_indices = @transform_4, window_bounds = array<i64: 1, 8, 9, 9>}, {transform_indices = @transform_5, window_bounds = array<i64: 1, 8, 9, 9>}, {transform_indices = @transform_6, window_bounds = array<i64: 1, 8, 9, 9>}, {transform_indices = @transform_7, window_bounds = array<i64: 1, 16, 16>}]} {
    %cst = arith.constant 0.000000e+00 : f32
    %0 = vector.broadcast %cst : f32 to vector<1x8x8xf32>
    %cst_0 = arith.constant 0.000000e+00 : f32
    %1 = vector.broadcast %cst_0 : f32 to vector<1x8x8xf32>
    %cst_1 = arith.constant 0.000000e+00 : f32
    %2 = vector.broadcast %cst_1 : f32 to vector<1x8x8xf32>
    %cst_2 = arith.constant 0.000000e+00 : f32
    %3 = vector.broadcast %cst_2 : f32 to vector<1x8x8xf32>
    %c0 = arith.constant 0 : index
    %c0_3 = arith.constant 0 : index
    %c0_4 = arith.constant 0 : index
    %c0_5 = arith.constant 0 : index
    %4 = vector.load %arg4[%c0, %c0_3, %c0_4, %c0_5] : memref<1x8x9x9xbf16, #tpu.memory_space<vmem>>, vector<1x1x9x9xbf16>
    %5 = vector.shape_cast %4 : vector<1x1x9x9xbf16> to vector<1x9x9xbf16>
    %6 = arith.extf %5 : vector<1x9x9xbf16> to vector<1x9x9xf32>
    %c0_6 = arith.constant 0 : index
    %c0_7 = arith.constant 0 : index
    %c0_8 = arith.constant 0 : index
    %c0_9 = arith.constant 0 : index
    %7 = vector.load %arg5[%c0_6, %c0_7, %c0_8, %c0_9] : memref<1x8x9x9xbf16, #tpu.memory_space<vmem>>, vector<1x1x9x9xbf16>
    %8 = vector.shape_cast %7 : vector<1x1x9x9xbf16> to vector<1x9x9xbf16>
    %9 = arith.extf %8 : vector<1x9x9xbf16> to vector<1x9x9xf32>
    %c0_10 = arith.constant 0 : index
    %c0_11 = arith.constant 0 : index
    %c0_12 = arith.constant 0 : index
    %c0_13 = arith.constant 0 : index
    %10 = vector.load %arg6[%c0_10, %c0_11, %c0_12, %c0_13] : memref<1x8x9x9xbf16, #tpu.memory_space<vmem>>, vector<1x1x9x9xbf16>
    %11 = vector.shape_cast %10 : vector<1x1x9x9xbf16> to vector<1x9x9xbf16>
    %12 = arith.extf %11 : vector<1x9x9xbf16> to vector<1x9x9xf32>
    %c0_14 = arith.constant 0 : index
    %c0_15 = arith.constant 0 : index
    %c0_16 = arith.constant 0 : index
    %c0_17 = arith.constant 0 : index
    %13 = vector.load %arg7[%c0_14, %c0_15, %c0_16, %c0_17] : memref<1x8x9x9xbf16, #tpu.memory_space<vmem>>, vector<1x1x9x9xbf16>
    %14 = vector.shape_cast %13 : vector<1x1x9x9xbf16> to vector<1x9x9xbf16>
    %15 = arith.extf %14 : vector<1x9x9xbf16> to vector<1x9x9xf32>
    %c0_18 = arith.constant 0 : index
    %16 = memref.load %arg1[%c0_18] : memref<73xf32, #tpu.memory_space<smem>>
    %17 = vector.extract_strided_slice %6 {offsets = [0, 0, 0], sizes = [1, 8, 8], strides = [1, 1, 1]} : vector<1x9x9xf32> to vector<1x8x8xf32>
    %18 = vector.broadcast %16 : f32 to vector<1x8x8xf32>
    %19 = arith.mulf %18, %17 : vector<1x8x8xf32>
    %20 = arith.addf %0, %19 : vector<1x8x8xf32>
    %c1 = arith.constant 1 : index
    %21 = memref.load %arg1[%c1] : memref<73xf32, #tpu.memory_space<smem>>
    %22 = vector.extract_strided_slice %9 {offsets = [0, 0, 0], sizes = [1, 8, 8], strides = [1, 1, 1]} : vector<1x9x9xf32> to vector<1x8x8xf32>
    %23 = vector.broadcast %21 : f32 to vector<1x8x8xf32>
    %24 = arith.mulf %23, %22 : vector<1x8x8xf32>
    %25 = arith.addf %1, %24 : vector<1x8x8xf32>
    %c2 = arith.constant 2 : index
    %26 = memref.load %arg1[%c2] : memref<73xf32, #tpu.memory_space<smem>>
    %27 = vector.extract_strided_slice %6 {offsets = [0, 0, 1], sizes = [1, 8, 8], strides = [1, 1, 1]} : vector<1x9x9xf32> to vector<1x8x8xf32>
    %28 = vector.broadcast %26 : f32 to vector<1x8x8xf32>
    %29 = arith.mulf %28, %27 : vector<1x8x8xf32>
    %30 = arith.addf %2, %29 : vector<1x8x8xf32>
    %c3 = arith.constant 3 : index
    %31 = memref.load %arg1[%c3] : memref<73xf32, #tpu.memory_space<smem>>
    %32 = vector.extract_strided_slice %12 {offsets = [0, 0, 0], sizes = [1, 8, 8], strides = [1, 1, 1]} : vector<1x9x9xf32> to vector<1x8x8xf32>
    %33 = vector.broadcast %31 : f32 to vector<1x8x8xf32>
    %34 = arith.mulf %33, %32 : vector<1x8x8xf32>
    %35 = arith.addf %3, %34 : vector<1x8x8xf32>
    %c4 = arith.constant 4 : index
    %36 = memref.load %arg1[%c4] : memref<73xf32, #tpu.memory_space<smem>>
    %37 = vector.extract_strided_slice %15 {offsets = [0, 0, 0], sizes = [1, 8, 8], strides = [1, 1, 1]} : vector<1x9x9xf32> to vector<1x8x8xf32>
    %38 = vector.broadcast %36 : f32 to vector<1x8x8xf32>
    %39 = arith.mulf %38, %37 : vector<1x8x8xf32>
    %40 = arith.addf %20, %39 : vector<1x8x8xf32>
    %c5 = arith.constant 5 : index
    %41 = memref.load %arg1[%c5] : memref<73xf32, #tpu.memory_space<smem>>
    %42 = vector.extract_strided_slice %12 {offsets = [0, 0, 1], sizes = [1, 8, 8], strides = [1, 1, 1]} : vector<1x9x9xf32> to vector<1x8x8xf32>
    %43 = vector.broadcast %41 : f32 to vector<1x8x8xf32>
    %44 = arith.mulf %43, %42 : vector<1x8x8xf32>
    %45 = arith.addf %25, %44 : vector<1x8x8xf32>
    %c6 = arith.constant 6 : index
    %46 = memref.load %arg1[%c6] : memref<73xf32, #tpu.memory_space<smem>>
    %47 = vector.extract_strided_slice %6 {offsets = [0, 1, 0], sizes = [1, 8, 8], strides = [1, 1, 1]} : vector<1x9x9xf32> to vector<1x8x8xf32>
    %48 = vector.broadcast %46 : f32 to vector<1x8x8xf32>
    %49 = arith.mulf %48, %47 : vector<1x8x8xf32>
    %50 = arith.addf %30, %49 : vector<1x8x8xf32>
    %c7 = arith.constant 7 : index
    %51 = memref.load %arg1[%c7] : memref<73xf32, #tpu.memory_space<smem>>
    %52 = vector.extract_strided_slice %9 {offsets = [0, 1, 0], sizes = [1, 8, 8], strides = [1, 1, 1]} : vector<1x9x9xf32> to vector<1x8x8xf32>
    %53 = vector.broadcast %51 : f32 to vector<1x8x8xf32>
    %54 = arith.mulf %53, %52 : vector<1x8x8xf32>
    %55 = arith.addf %35, %54 : vector<1x8x8xf32>
    %c8 = arith.constant 8 : index
    %56 = memref.load %arg1[%c8] : memref<73xf32, #tpu.memory_space<smem>>
    %57 = vector.extract_strided_slice %6 {offsets = [0, 1, 1], sizes = [1, 8, 8], strides = [1, 1, 1]} : vector<1x9x9xf32> to vector<1x8x8xf32>
    %58 = vector.broadcast %56 : f32 to vector<1x8x8xf32>
    %59 = arith.mulf %58, %57 : vector<1x8x8xf32>
    %60 = arith.addf %40, %59 : vector<1x8x8xf32>
    %c0_19 = arith.constant 0 : index
    %c1_20 = arith.constant 1 : index
    %c0_21 = arith.constant 0 : index
    %c0_22 = arith.constant 0 : index
    %61 = vector.load %arg4[%c0_19, %c1_20, %c0_21, %c0_22] : memref<1x8x9x9xbf16, #tpu.memory_space<vmem>>, vector<1x1x9x9xbf16>
    %62 = vector.shape_cast %61 : vector<1x1x9x9xbf16> to vector<1x9x9xbf16>
    %63 = arith.extf %62 : vector<1x9x9xbf16> to vector<1x9x9xf32>
    %c0_23 = arith.constant 0 : index
    %c1_24 = arith.constant 1 : index
    %c0_25 = arith.constant 0 : index
    %c0_26 = arith.constant 0 : index
    %64 = vector.load %arg5[%c0_23, %c1_24, %c0_25, %c0_26] : memref<1x8x9x9xbf16, #tpu.memory_space<vmem>>, vector<1x1x9x9xbf16>
    %65 = vector.shape_cast %64 : vector<1x1x9x9xbf16> to vector<1x9x9xbf16>
    %66 = arith.extf %65 : vector<1x9x9xbf16> to vector<1x9x9xf32>
    %c0_27 = arith.constant 0 : index
    %c1_28 = arith.constant 1 : index
    %c0_29 = arith.constant 0 : index
    %c0_30 = arith.constant 0 : index
    %67 = vector.load %arg6[%c0_27, %c1_28, %c0_29, %c0_30] : memref<1x8x9x9xbf16, #tpu.memory_space<vmem>>, vector<1x1x9x9xbf16>
    %68 = vector.shape_cast %67 : vector<1x1x9x9xbf16> to vector<1x9x9xbf16>
    %69 = arith.extf %68 : vector<1x9x9xbf16> to vector<1x9x9xf32>
    %c0_31 = arith.constant 0 : index
    %c1_32 = arith.constant 1 : index
    %c0_33 = arith.constant 0 : index
    %c0_34 = arith.constant 0 : index
    %70 = vector.load %arg7[%c0_31, %c1_32, %c0_33, %c0_34] : memref<1x8x9x9xbf16, #tpu.memory_space<vmem>>, vector<1x1x9x9xbf16>
    %71 = vector.shape_cast %70 : vector<1x1x9x9xbf16> to vector<1x9x9xbf16>
    %72 = arith.extf %71 : vector<1x9x9xbf16> to vector<1x9x9xf32>
    %c9 = arith.constant 9 : index
    %73 = memref.load %arg1[%c9] : memref<73xf32, #tpu.memory_space<smem>>
    %74 = vector.extract_strided_slice %63 {offsets = [0, 0, 0], sizes = [1, 8, 8], strides = [1, 1, 1]} : vector<1x9x9xf32> to vector<1x8x8xf32>
    %75 = vector.broadcast %73 : f32 to vector<1x8x8xf32>
    %76 = arith.mulf %75, %74 : vector<1x8x8xf32>
    %77 = arith.addf %60, %76 : vector<1x8x8xf32>
    %c10 = arith.constant 10 : index
    %78 = memref.load %arg1[%c10] : memref<73xf32, #tpu.memory_space<smem>>
    %79 = vector.extract_strided_slice %66 {offsets = [0, 0, 0], sizes = [1, 8, 8], strides = [1, 1, 1]} : vector<1x9x9xf32> to vector<1x8x8xf32>
    %80 = vector.broadcast %78 : f32 to vector<1x8x8xf32>
    %81 = arith.mulf %80, %79 : vector<1x8x8xf32>
    %82 = arith.addf %45, %81 : vector<1x8x8xf32>
    %c11 = arith.constant 11 : index
    %83 = memref.load %arg1[%c11] : memref<73xf32, #tpu.memory_space<smem>>
    %84 = vector.extract_strided_slice %63 {offsets = [0, 0, 1], sizes = [1, 8, 8], strides = [1, 1, 1]} : vector<1x9x9xf32> to vector<1x8x8xf32>
    %85 = vector.broadcast %83 : f32 to vector<1x8x8xf32>
    %86 = arith.mulf %85, %84 : vector<1x8x8xf32>
    %87 = arith.addf %50, %86 : vector<1x8x8xf32>
    %c12 = arith.constant 12 : index
    %88 = memref.load %arg1[%c12] : memref<73xf32, #tpu.memory_space<smem>>
    %89 = vector.extract_strided_slice %69 {offsets = [0, 0, 0], sizes = [1, 8, 8], strides = [1, 1, 1]} : vector<1x9x9xf32> to vector<1x8x8xf32>
    %90 = vector.broadcast %88 : f32 to vector<1x8x8xf32>
    %91 = arith.mulf %90, %89 : vector<1x8x8xf32>
    %92 = arith.addf %55, %91 : vector<1x8x8xf32>
    %c13 = arith.constant 13 : index
    %93 = memref.load %arg1[%c13] : memref<73xf32, #tpu.memory_space<smem>>
    %94 = vector.extract_strided_slice %72 {offsets = [0, 0, 0], sizes = [1, 8, 8], strides = [1, 1, 1]} : vector<1x9x9xf32> to vector<1x8x8xf32>
    %95 = vector.broadcast %93 : f32 to vector<1x8x8xf32>
    %96 = arith.mulf %95, %94 : vector<1x8x8xf32>
    %97 = arith.addf %77, %96 : vector<1x8x8xf32>
    %c14 = arith.constant 14 : index
    %98 = memref.load %arg1[%c14] : memref<73xf32, #tpu.memory_space<smem>>
    %99 = vector.extract_strided_slice %69 {offsets = [0, 0, 1], sizes = [1, 8, 8], strides = [1, 1, 1]} : vector<1x9x9xf32> to vector<1x8x8xf32>
    %100 = vector.broadcast %98 : f32 to vector<1x8x8xf32>
    %101 = arith.mulf %100, %99 : vector<1x8x8xf32>
    %102 = arith.addf %82, %101 : vector<1x8x8xf32>
    %c15 = arith.constant 15 : index
    %103 = memref.load %arg1[%c15] : memref<73xf32, #tpu.memory_space<smem>>
    %104 = vector.extract_strided_slice %63 {offsets = [0, 1, 0], sizes = [1, 8, 8], strides = [1, 1, 1]} : vector<1x9x9xf32> to vector<1x8x8xf32>
    %105 = vector.broadcast %103 : f32 to vector<1x8x8xf32>
    %106 = arith.mulf %105, %104 : vector<1x8x8xf32>
    %107 = arith.addf %87, %106 : vector<1x8x8xf32>
    %c16 = arith.constant 16 : index
    %108 = memref.load %arg1[%c16] : memref<73xf32, #tpu.memory_space<smem>>
    %109 = vector.extract_strided_slice %66 {offsets = [0, 1, 0], sizes = [1, 8, 8], strides = [1, 1, 1]} : vector<1x9x9xf32> to vector<1x8x8xf32>
    %110 = vector.broadcast %108 : f32 to vector<1x8x8xf32>
    %111 = arith.mulf %110, %109 : vector<1x8x8xf32>
    %112 = arith.addf %92, %111 : vector<1x8x8xf32>
    %c17 = arith.constant 17 : index
    %113 = memref.load %arg1[%c17] : memref<73xf32, #tpu.memory_space<smem>>
    %114 = vector.extract_strided_slice %63 {offsets = [0, 1, 1], sizes = [1, 8, 8], strides = [1, 1, 1]} : vector<1x9x9xf32> to vector<1x8x8xf32>
    %115 = vector.broadcast %113 : f32 to vector<1x8x8xf32>
    %116 = arith.mulf %115, %114 : vector<1x8x8xf32>
    %117 = arith.addf %97, %116 : vector<1x8x8xf32>
    %c0_35 = arith.constant 0 : index
    %c2_36 = arith.constant 2 : index
    %c0_37 = arith.constant 0 : index
    %c0_38 = arith.constant 0 : index
    %118 = vector.load %arg4[%c0_35, %c2_36, %c0_37, %c0_38] : memref<1x8x9x9xbf16, #tpu.memory_space<vmem>>, vector<1x1x9x9xbf16>
    %119 = vector.shape_cast %118 : vector<1x1x9x9xbf16> to vector<1x9x9xbf16>
    %120 = arith.extf %119 : vector<1x9x9xbf16> to vector<1x9x9xf32>
    %c0_39 = arith.constant 0 : index
    %c2_40 = arith.constant 2 : index
    %c0_41 = arith.constant 0 : index
    %c0_42 = arith.constant 0 : index
    %121 = vector.load %arg5[%c0_39, %c2_40, %c0_41, %c0_42] : memref<1x8x9x9xbf16, #tpu.memory_space<vmem>>, vector<1x1x9x9xbf16>
    %122 = vector.shape_cast %121 : vector<1x1x9x9xbf16> to vector<1x9x9xbf16>
    %123 = arith.extf %122 : vector<1x9x9xbf16> to vector<1x9x9xf32>
    %c0_43 = arith.constant 0 : index
    %c2_44 = arith.constant 2 : index
    %c0_45 = arith.constant 0 : index
    %c0_46 = arith.constant 0 : index
    %124 = vector.load %arg6[%c0_43, %c2_44, %c0_45, %c0_46] : memref<1x8x9x9xbf16, #tpu.memory_space<vmem>>, vector<1x1x9x9xbf16>
    %125 = vector.shape_cast %124 : vector<1x1x9x9xbf16> to vector<1x9x9xbf16>
    %126 = arith.extf %125 : vector<1x9x9xbf16> to vector<1x9x9xf32>
    %c0_47 = arith.constant 0 : index
    %c2_48 = arith.constant 2 : index
    %c0_49 = arith.constant 0 : index
    %c0_50 = arith.constant 0 : index
    %127 = vector.load %arg7[%c0_47, %c2_48, %c0_49, %c0_50] : memref<1x8x9x9xbf16, #tpu.memory_space<vmem>>, vector<1x1x9x9xbf16>
    %128 = vector.shape_cast %127 : vector<1x1x9x9xbf16> to vector<1x9x9xbf16>
    %129 = arith.extf %128 : vector<1x9x9xbf16> to vector<1x9x9xf32>
    %c18 = arith.constant 18 : index
    %130 = memref.load %arg1[%c18] : memref<73xf32, #tpu.memory_space<smem>>
    %131 = vector.extract_strided_slice %120 {offsets = [0, 0, 0], sizes = [1, 8, 8], strides = [1, 1, 1]} : vector<1x9x9xf32> to vector<1x8x8xf32>
    %132 = vector.broadcast %130 : f32 to vector<1x8x8xf32>
    %133 = arith.mulf %132, %131 : vector<1x8x8xf32>
    %134 = arith.addf %117, %133 : vector<1x8x8xf32>
    %c19 = arith.constant 19 : index
    %135 = memref.load %arg1[%c19] : memref<73xf32, #tpu.memory_space<smem>>
    %136 = vector.extract_strided_slice %123 {offsets = [0, 0, 0], sizes = [1, 8, 8], strides = [1, 1, 1]} : vector<1x9x9xf32> to vector<1x8x8xf32>
    %137 = vector.broadcast %135 : f32 to vector<1x8x8xf32>
    %138 = arith.mulf %137, %136 : vector<1x8x8xf32>
    %139 = arith.addf %102, %138 : vector<1x8x8xf32>
    %c20 = arith.constant 20 : index
    %140 = memref.load %arg1[%c20] : memref<73xf32, #tpu.memory_space<smem>>
    %141 = vector.extract_strided_slice %120 {offsets = [0, 0, 1], sizes = [1, 8, 8], strides = [1, 1, 1]} : vector<1x9x9xf32> to vector<1x8x8xf32>
    %142 = vector.broadcast %140 : f32 to vector<1x8x8xf32>
    %143 = arith.mulf %142, %141 : vector<1x8x8xf32>
    %144 = arith.addf %107, %143 : vector<1x8x8xf32>
    %c21 = arith.constant 21 : index
    %145 = memref.load %arg1[%c21] : memref<73xf32, #tpu.memory_space<smem>>
    %146 = vector.extract_strided_slice %126 {offsets = [0, 0, 0], sizes = [1, 8, 8], strides = [1, 1, 1]} : vector<1x9x9xf32> to vector<1x8x8xf32>
    %147 = vector.broadcast %145 : f32 to vector<1x8x8xf32>
    %148 = arith.mulf %147, %146 : vector<1x8x8xf32>
    %149 = arith.addf %112, %148 : vector<1x8x8xf32>
    %c22 = arith.constant 22 : index
    %150 = memref.load %arg1[%c22] : memref<73xf32, #tpu.memory_space<smem>>
    %151 = vector.extract_strided_slice %129 {offsets = [0, 0, 0], sizes = [1, 8, 8], strides = [1, 1, 1]} : vector<1x9x9xf32> to vector<1x8x8xf32>
    %152 = vector.broadcast %150 : f32 to vector<1x8x8xf32>
    %153 = arith.mulf %152, %151 : vector<1x8x8xf32>
    %154 = arith.addf %134, %153 : vector<1x8x8xf32>
    %c23 = arith.constant 23 : index
    %155 = memref.load %arg1[%c23] : memref<73xf32, #tpu.memory_space<smem>>
    %156 = vector.extract_strided_slice %126 {offsets = [0, 0, 1], sizes = [1, 8, 8], strides = [1, 1, 1]} : vector<1x9x9xf32> to vector<1x8x8xf32>
    %157 = vector.broadcast %155 : f32 to vector<1x8x8xf32>
    %158 = arith.mulf %157, %156 : vector<1x8x8xf32>
    %159 = arith.addf %139, %158 : vector<1x8x8xf32>
    %c24 = arith.constant 24 : index
    %160 = memref.load %arg1[%c24] : memref<73xf32, #tpu.memory_space<smem>>
    %161 = vector.extract_strided_slice %120 {offsets = [0, 1, 0], sizes = [1, 8, 8], strides = [1, 1, 1]} : vector<1x9x9xf32> to vector<1x8x8xf32>
    %162 = vector.broadcast %160 : f32 to vector<1x8x8xf32>
    %163 = arith.mulf %162, %161 : vector<1x8x8xf32>
    %164 = arith.addf %144, %163 : vector<1x8x8xf32>
    %c25 = arith.constant 25 : index
    %165 = memref.load %arg1[%c25] : memref<73xf32, #tpu.memory_space<smem>>
    %166 = vector.extract_strided_slice %123 {offsets = [0, 1, 0], sizes = [1, 8, 8], strides = [1, 1, 1]} : vector<1x9x9xf32> to vector<1x8x8xf32>
    %167 = vector.broadcast %165 : f32 to vector<1x8x8xf32>
    %168 = arith.mulf %167, %166 : vector<1x8x8xf32>
    %169 = arith.addf %149, %168 : vector<1x8x8xf32>
    %c26 = arith.constant 26 : index
    %170 = memref.load %arg1[%c26] : memref<73xf32, #tpu.memory_space<smem>>
    %171 = vector.extract_strided_slice %120 {offsets = [0, 1, 1], sizes = [1, 8, 8], strides = [1, 1, 1]} : vector<1x9x9xf32> to vector<1x8x8xf32>
    %172 = vector.broadcast %170 : f32 to vector<1x8x8xf32>
    %173 = arith.mulf %172, %171 : vector<1x8x8xf32>
    %174 = arith.addf %154, %173 : vector<1x8x8xf32>
    %c0_51 = arith.constant 0 : index
    %c3_52 = arith.constant 3 : index
    %c0_53 = arith.constant 0 : index
    %c0_54 = arith.constant 0 : index
    %175 = vector.load %arg4[%c0_51, %c3_52, %c0_53, %c0_54] : memref<1x8x9x9xbf16, #tpu.memory_space<vmem>>, vector<1x1x9x9xbf16>
    %176 = vector.shape_cast %175 : vector<1x1x9x9xbf16> to vector<1x9x9xbf16>
    %177 = arith.extf %176 : vector<1x9x9xbf16> to vector<1x9x9xf32>
    %c0_55 = arith.constant 0 : index
    %c3_56 = arith.constant 3 : index
    %c0_57 = arith.constant 0 : index
    %c0_58 = arith.constant 0 : index
    %178 = vector.load %arg5[%c0_55, %c3_56, %c0_57, %c0_58] : memref<1x8x9x9xbf16, #tpu.memory_space<vmem>>, vector<1x1x9x9xbf16>
    %179 = vector.shape_cast %178 : vector<1x1x9x9xbf16> to vector<1x9x9xbf16>
    %180 = arith.extf %179 : vector<1x9x9xbf16> to vector<1x9x9xf32>
    %c0_59 = arith.constant 0 : index
    %c3_60 = arith.constant 3 : index
    %c0_61 = arith.constant 0 : index
    %c0_62 = arith.constant 0 : index
    %181 = vector.load %arg6[%c0_59, %c3_60, %c0_61, %c0_62] : memref<1x8x9x9xbf16, #tpu.memory_space<vmem>>, vector<1x1x9x9xbf16>
    %182 = vector.shape_cast %181 : vector<1x1x9x9xbf16> to vector<1x9x9xbf16>
    %183 = arith.extf %182 : vector<1x9x9xbf16> to vector<1x9x9xf32>
    %c0_63 = arith.constant 0 : index
    %c3_64 = arith.constant 3 : index
    %c0_65 = arith.constant 0 : index
    %c0_66 = arith.constant 0 : index
    %184 = vector.load %arg7[%c0_63, %c3_64, %c0_65, %c0_66] : memref<1x8x9x9xbf16, #tpu.memory_space<vmem>>, vector<1x1x9x9xbf16>
    %185 = vector.shape_cast %184 : vector<1x1x9x9xbf16> to vector<1x9x9xbf16>
    %186 = arith.extf %185 : vector<1x9x9xbf16> to vector<1x9x9xf32>
    %c27 = arith.constant 27 : index
    %187 = memref.load %arg1[%c27] : memref<73xf32, #tpu.memory_space<smem>>
    %188 = vector.extract_strided_slice %177 {offsets = [0, 0, 0], sizes = [1, 8, 8], strides = [1, 1, 1]} : vector<1x9x9xf32> to vector<1x8x8xf32>
    %189 = vector.broadcast %187 : f32 to vector<1x8x8xf32>
    %190 = arith.mulf %189, %188 : vector<1x8x8xf32>
    %191 = arith.addf %174, %190 : vector<1x8x8xf32>
    %c28 = arith.constant 28 : index
    %192 = memref.load %arg1[%c28] : memref<73xf32, #tpu.memory_space<smem>>
    %193 = vector.extract_strided_slice %180 {offsets = [0, 0, 0], sizes = [1, 8, 8], strides = [1, 1, 1]} : vector<1x9x9xf32> to vector<1x8x8xf32>
    %194 = vector.broadcast %192 : f32 to vector<1x8x8xf32>
    %195 = arith.mulf %194, %193 : vector<1x8x8xf32>
    %196 = arith.addf %159, %195 : vector<1x8x8xf32>
    %c29 = arith.constant 29 : index
    %197 = memref.load %arg1[%c29] : memref<73xf32, #tpu.memory_space<smem>>
    %198 = vector.extract_strided_slice %177 {offsets = [0, 0, 1], sizes = [1, 8, 8], strides = [1, 1, 1]} : vector<1x9x9xf32> to vector<1x8x8xf32>
    %199 = vector.broadcast %197 : f32 to vector<1x8x8xf32>
    %200 = arith.mulf %199, %198 : vector<1x8x8xf32>
    %201 = arith.addf %164, %200 : vector<1x8x8xf32>
    %c30 = arith.constant 30 : index
    %202 = memref.load %arg1[%c30] : memref<73xf32, #tpu.memory_space<smem>>
    %203 = vector.extract_strided_slice %183 {offsets = [0, 0, 0], sizes = [1, 8, 8], strides = [1, 1, 1]} : vector<1x9x9xf32> to vector<1x8x8xf32>
    %204 = vector.broadcast %202 : f32 to vector<1x8x8xf32>
    %205 = arith.mulf %204, %203 : vector<1x8x8xf32>
    %206 = arith.addf %169, %205 : vector<1x8x8xf32>
    %c31 = arith.constant 31 : index
    %207 = memref.load %arg1[%c31] : memref<73xf32, #tpu.memory_space<smem>>
    %208 = vector.extract_strided_slice %186 {offsets = [0, 0, 0], sizes = [1, 8, 8], strides = [1, 1, 1]} : vector<1x9x9xf32> to vector<1x8x8xf32>
    %209 = vector.broadcast %207 : f32 to vector<1x8x8xf32>
    %210 = arith.mulf %209, %208 : vector<1x8x8xf32>
    %211 = arith.addf %191, %210 : vector<1x8x8xf32>
    %c32 = arith.constant 32 : index
    %212 = memref.load %arg1[%c32] : memref<73xf32, #tpu.memory_space<smem>>
    %213 = vector.extract_strided_slice %183 {offsets = [0, 0, 1], sizes = [1, 8, 8], strides = [1, 1, 1]} : vector<1x9x9xf32> to vector<1x8x8xf32>
    %214 = vector.broadcast %212 : f32 to vector<1x8x8xf32>
    %215 = arith.mulf %214, %213 : vector<1x8x8xf32>
    %216 = arith.addf %196, %215 : vector<1x8x8xf32>
    %c33 = arith.constant 33 : index
    %217 = memref.load %arg1[%c33] : memref<73xf32, #tpu.memory_space<smem>>
    %218 = vector.extract_strided_slice %177 {offsets = [0, 1, 0], sizes = [1, 8, 8], strides = [1, 1, 1]} : vector<1x9x9xf32> to vector<1x8x8xf32>
    %219 = vector.broadcast %217 : f32 to vector<1x8x8xf32>
    %220 = arith.mulf %219, %218 : vector<1x8x8xf32>
    %221 = arith.addf %201, %220 : vector<1x8x8xf32>
    %c34 = arith.constant 34 : index
    %222 = memref.load %arg1[%c34] : memref<73xf32, #tpu.memory_space<smem>>
    %223 = vector.extract_strided_slice %180 {offsets = [0, 1, 0], sizes = [1, 8, 8], strides = [1, 1, 1]} : vector<1x9x9xf32> to vector<1x8x8xf32>
    %224 = vector.broadcast %222 : f32 to vector<1x8x8xf32>
    %225 = arith.mulf %224, %223 : vector<1x8x8xf32>
    %226 = arith.addf %206, %225 : vector<1x8x8xf32>
    %c35 = arith.constant 35 : index
    %227 = memref.load %arg1[%c35] : memref<73xf32, #tpu.memory_space<smem>>
    %228 = vector.extract_strided_slice %177 {offsets = [0, 1, 1], sizes = [1, 8, 8], strides = [1, 1, 1]} : vector<1x9x9xf32> to vector<1x8x8xf32>
    %229 = vector.broadcast %227 : f32 to vector<1x8x8xf32>
    %230 = arith.mulf %229, %228 : vector<1x8x8xf32>
    %231 = arith.addf %211, %230 : vector<1x8x8xf32>
    %c0_67 = arith.constant 0 : index
    %c4_68 = arith.constant 4 : index
    %c0_69 = arith.constant 0 : index
    %c0_70 = arith.constant 0 : index
    %232 = vector.load %arg4[%c0_67, %c4_68, %c0_69, %c0_70] : memref<1x8x9x9xbf16, #tpu.memory_space<vmem>>, vector<1x1x9x9xbf16>
    %233 = vector.shape_cast %232 : vector<1x1x9x9xbf16> to vector<1x9x9xbf16>
    %234 = arith.extf %233 : vector<1x9x9xbf16> to vector<1x9x9xf32>
    %c0_71 = arith.constant 0 : index
    %c4_72 = arith.constant 4 : index
    %c0_73 = arith.constant 0 : index
    %c0_74 = arith.constant 0 : index
    %235 = vector.load %arg5[%c0_71, %c4_72, %c0_73, %c0_74] : memref<1x8x9x9xbf16, #tpu.memory_space<vmem>>, vector<1x1x9x9xbf16>
    %236 = vector.shape_cast %235 : vector<1x1x9x9xbf16> to vector<1x9x9xbf16>
    %237 = arith.extf %236 : vector<1x9x9xbf16> to vector<1x9x9xf32>
    %c0_75 = arith.constant 0 : index
    %c4_76 = arith.constant 4 : index
    %c0_77 = arith.constant 0 : index
    %c0_78 = arith.constant 0 : index
    %238 = vector.load %arg6[%c0_75, %c4_76, %c0_77, %c0_78] : memref<1x8x9x9xbf16, #tpu.memory_space<vmem>>, vector<1x1x9x9xbf16>
    %239 = vector.shape_cast %238 : vector<1x1x9x9xbf16> to vector<1x9x9xbf16>
    %240 = arith.extf %239 : vector<1x9x9xbf16> to vector<1x9x9xf32>
    %c0_79 = arith.constant 0 : index
    %c4_80 = arith.constant 4 : index
    %c0_81 = arith.constant 0 : index
    %c0_82 = arith.constant 0 : index
    %241 = vector.load %arg7[%c0_79, %c4_80, %c0_81, %c0_82] : memref<1x8x9x9xbf16, #tpu.memory_space<vmem>>, vector<1x1x9x9xbf16>
    %242 = vector.shape_cast %241 : vector<1x1x9x9xbf16> to vector<1x9x9xbf16>
    %243 = arith.extf %242 : vector<1x9x9xbf16> to vector<1x9x9xf32>
    %c36 = arith.constant 36 : index
    %244 = memref.load %arg1[%c36] : memref<73xf32, #tpu.memory_space<smem>>
    %245 = vector.extract_strided_slice %234 {offsets = [0, 0, 0], sizes = [1, 8, 8], strides = [1, 1, 1]} : vector<1x9x9xf32> to vector<1x8x8xf32>
    %246 = vector.broadcast %244 : f32 to vector<1x8x8xf32>
    %247 = arith.mulf %246, %245 : vector<1x8x8xf32>
    %248 = arith.addf %231, %247 : vector<1x8x8xf32>
    %c37 = arith.constant 37 : index
    %249 = memref.load %arg1[%c37] : memref<73xf32, #tpu.memory_space<smem>>
    %250 = vector.extract_strided_slice %237 {offsets = [0, 0, 0], sizes = [1, 8, 8], strides = [1, 1, 1]} : vector<1x9x9xf32> to vector<1x8x8xf32>
    %251 = vector.broadcast %249 : f32 to vector<1x8x8xf32>
    %252 = arith.mulf %251, %250 : vector<1x8x8xf32>
    %253 = arith.addf %216, %252 : vector<1x8x8xf32>
    %c38 = arith.constant 38 : index
    %254 = memref.load %arg1[%c38] : memref<73xf32, #tpu.memory_space<smem>>
    %255 = vector.extract_strided_slice %234 {offsets = [0, 0, 1], sizes = [1, 8, 8], strides = [1, 1, 1]} : vector<1x9x9xf32> to vector<1x8x8xf32>
    %256 = vector.broadcast %254 : f32 to vector<1x8x8xf32>
    %257 = arith.mulf %256, %255 : vector<1x8x8xf32>
    %258 = arith.addf %221, %257 : vector<1x8x8xf32>
    %c39 = arith.constant 39 : index
    %259 = memref.load %arg1[%c39] : memref<73xf32, #tpu.memory_space<smem>>
    %260 = vector.extract_strided_slice %240 {offsets = [0, 0, 0], sizes = [1, 8, 8], strides = [1, 1, 1]} : vector<1x9x9xf32> to vector<1x8x8xf32>
    %261 = vector.broadcast %259 : f32 to vector<1x8x8xf32>
    %262 = arith.mulf %261, %260 : vector<1x8x8xf32>
    %263 = arith.addf %226, %262 : vector<1x8x8xf32>
    %c40 = arith.constant 40 : index
    %264 = memref.load %arg1[%c40] : memref<73xf32, #tpu.memory_space<smem>>
    %265 = vector.extract_strided_slice %243 {offsets = [0, 0, 0], sizes = [1, 8, 8], strides = [1, 1, 1]} : vector<1x9x9xf32> to vector<1x8x8xf32>
    %266 = vector.broadcast %264 : f32 to vector<1x8x8xf32>
    %267 = arith.mulf %266, %265 : vector<1x8x8xf32>
    %268 = arith.addf %248, %267 : vector<1x8x8xf32>
    %c41 = arith.constant 41 : index
    %269 = memref.load %arg1[%c41] : memref<73xf32, #tpu.memory_space<smem>>
    %270 = vector.extract_strided_slice %240 {offsets = [0, 0, 1], sizes = [1, 8, 8], strides = [1, 1, 1]} : vector<1x9x9xf32> to vector<1x8x8xf32>
    %271 = vector.broadcast %269 : f32 to vector<1x8x8xf32>
    %272 = arith.mulf %271, %270 : vector<1x8x8xf32>
    %273 = arith.addf %253, %272 : vector<1x8x8xf32>
    %c42 = arith.constant 42 : index
    %274 = memref.load %arg1[%c42] : memref<73xf32, #tpu.memory_space<smem>>
    %275 = vector.extract_strided_slice %234 {offsets = [0, 1, 0], sizes = [1, 8, 8], strides = [1, 1, 1]} : vector<1x9x9xf32> to vector<1x8x8xf32>
    %276 = vector.broadcast %274 : f32 to vector<1x8x8xf32>
    %277 = arith.mulf %276, %275 : vector<1x8x8xf32>
    %278 = arith.addf %258, %277 : vector<1x8x8xf32>
    %c43 = arith.constant 43 : index
    %279 = memref.load %arg1[%c43] : memref<73xf32, #tpu.memory_space<smem>>
    %280 = vector.extract_strided_slice %237 {offsets = [0, 1, 0], sizes = [1, 8, 8], strides = [1, 1, 1]} : vector<1x9x9xf32> to vector<1x8x8xf32>
    %281 = vector.broadcast %279 : f32 to vector<1x8x8xf32>
    %282 = arith.mulf %281, %280 : vector<1x8x8xf32>
    %283 = arith.addf %263, %282 : vector<1x8x8xf32>
    %c44 = arith.constant 44 : index
    %284 = memref.load %arg1[%c44] : memref<73xf32, #tpu.memory_space<smem>>
    %285 = vector.extract_strided_slice %234 {offsets = [0, 1, 1], sizes = [1, 8, 8], strides = [1, 1, 1]} : vector<1x9x9xf32> to vector<1x8x8xf32>
    %286 = vector.broadcast %284 : f32 to vector<1x8x8xf32>
    %287 = arith.mulf %286, %285 : vector<1x8x8xf32>
    %288 = arith.addf %268, %287 : vector<1x8x8xf32>
    %c0_83 = arith.constant 0 : index
    %c5_84 = arith.constant 5 : index
    %c0_85 = arith.constant 0 : index
    %c0_86 = arith.constant 0 : index
    %289 = vector.load %arg4[%c0_83, %c5_84, %c0_85, %c0_86] : memref<1x8x9x9xbf16, #tpu.memory_space<vmem>>, vector<1x1x9x9xbf16>
    %290 = vector.shape_cast %289 : vector<1x1x9x9xbf16> to vector<1x9x9xbf16>
    %291 = arith.extf %290 : vector<1x9x9xbf16> to vector<1x9x9xf32>
    %c0_87 = arith.constant 0 : index
    %c5_88 = arith.constant 5 : index
    %c0_89 = arith.constant 0 : index
    %c0_90 = arith.constant 0 : index
    %292 = vector.load %arg5[%c0_87, %c5_88, %c0_89, %c0_90] : memref<1x8x9x9xbf16, #tpu.memory_space<vmem>>, vector<1x1x9x9xbf16>
    %293 = vector.shape_cast %292 : vector<1x1x9x9xbf16> to vector<1x9x9xbf16>
    %294 = arith.extf %293 : vector<1x9x9xbf16> to vector<1x9x9xf32>
    %c0_91 = arith.constant 0 : index
    %c5_92 = arith.constant 5 : index
    %c0_93 = arith.constant 0 : index
    %c0_94 = arith.constant 0 : index
    %295 = vector.load %arg6[%c0_91, %c5_92, %c0_93, %c0_94] : memref<1x8x9x9xbf16, #tpu.memory_space<vmem>>, vector<1x1x9x9xbf16>
    %296 = vector.shape_cast %295 : vector<1x1x9x9xbf16> to vector<1x9x9xbf16>
    %297 = arith.extf %296 : vector<1x9x9xbf16> to vector<1x9x9xf32>
    %c0_95 = arith.constant 0 : index
    %c5_96 = arith.constant 5 : index
    %c0_97 = arith.constant 0 : index
    %c0_98 = arith.constant 0 : index
    %298 = vector.load %arg7[%c0_95, %c5_96, %c0_97, %c0_98] : memref<1x8x9x9xbf16, #tpu.memory_space<vmem>>, vector<1x1x9x9xbf16>
    %299 = vector.shape_cast %298 : vector<1x1x9x9xbf16> to vector<1x9x9xbf16>
    %300 = arith.extf %299 : vector<1x9x9xbf16> to vector<1x9x9xf32>
    %c45 = arith.constant 45 : index
    %301 = memref.load %arg1[%c45] : memref<73xf32, #tpu.memory_space<smem>>
    %302 = vector.extract_strided_slice %291 {offsets = [0, 0, 0], sizes = [1, 8, 8], strides = [1, 1, 1]} : vector<1x9x9xf32> to vector<1x8x8xf32>
    %303 = vector.broadcast %301 : f32 to vector<1x8x8xf32>
    %304 = arith.mulf %303, %302 : vector<1x8x8xf32>
    %305 = arith.addf %288, %304 : vector<1x8x8xf32>
    %c46 = arith.constant 46 : index
    %306 = memref.load %arg1[%c46] : memref<73xf32, #tpu.memory_space<smem>>
    %307 = vector.extract_strided_slice %294 {offsets = [0, 0, 0], sizes = [1, 8, 8], strides = [1, 1, 1]} : vector<1x9x9xf32> to vector<1x8x8xf32>
    %308 = vector.broadcast %306 : f32 to vector<1x8x8xf32>
    %309 = arith.mulf %308, %307 : vector<1x8x8xf32>
    %310 = arith.addf %273, %309 : vector<1x8x8xf32>
    %c47 = arith.constant 47 : index
    %311 = memref.load %arg1[%c47] : memref<73xf32, #tpu.memory_space<smem>>
    %312 = vector.extract_strided_slice %291 {offsets = [0, 0, 1], sizes = [1, 8, 8], strides = [1, 1, 1]} : vector<1x9x9xf32> to vector<1x8x8xf32>
    %313 = vector.broadcast %311 : f32 to vector<1x8x8xf32>
    %314 = arith.mulf %313, %312 : vector<1x8x8xf32>
    %315 = arith.addf %278, %314 : vector<1x8x8xf32>
    %c48 = arith.constant 48 : index
    %316 = memref.load %arg1[%c48] : memref<73xf32, #tpu.memory_space<smem>>
    %317 = vector.extract_strided_slice %297 {offsets = [0, 0, 0], sizes = [1, 8, 8], strides = [1, 1, 1]} : vector<1x9x9xf32> to vector<1x8x8xf32>
    %318 = vector.broadcast %316 : f32 to vector<1x8x8xf32>
    %319 = arith.mulf %318, %317 : vector<1x8x8xf32>
    %320 = arith.addf %283, %319 : vector<1x8x8xf32>
    %c49 = arith.constant 49 : index
    %321 = memref.load %arg1[%c49] : memref<73xf32, #tpu.memory_space<smem>>
    %322 = vector.extract_strided_slice %300 {offsets = [0, 0, 0], sizes = [1, 8, 8], strides = [1, 1, 1]} : vector<1x9x9xf32> to vector<1x8x8xf32>
    %323 = vector.broadcast %321 : f32 to vector<1x8x8xf32>
    %324 = arith.mulf %323, %322 : vector<1x8x8xf32>
    %325 = arith.addf %305, %324 : vector<1x8x8xf32>
    %c50 = arith.constant 50 : index
    %326 = memref.load %arg1[%c50] : memref<73xf32, #tpu.memory_space<smem>>
    %327 = vector.extract_strided_slice %297 {offsets = [0, 0, 1], sizes = [1, 8, 8], strides = [1, 1, 1]} : vector<1x9x9xf32> to vector<1x8x8xf32>
    %328 = vector.broadcast %326 : f32 to vector<1x8x8xf32>
    %329 = arith.mulf %328, %327 : vector<1x8x8xf32>
    %330 = arith.addf %310, %329 : vector<1x8x8xf32>
    %c51 = arith.constant 51 : index
    %331 = memref.load %arg1[%c51] : memref<73xf32, #tpu.memory_space<smem>>
    %332 = vector.extract_strided_slice %291 {offsets = [0, 1, 0], sizes = [1, 8, 8], strides = [1, 1, 1]} : vector<1x9x9xf32> to vector<1x8x8xf32>
    %333 = vector.broadcast %331 : f32 to vector<1x8x8xf32>
    %334 = arith.mulf %333, %332 : vector<1x8x8xf32>
    %335 = arith.addf %315, %334 : vector<1x8x8xf32>
    %c52 = arith.constant 52 : index
    %336 = memref.load %arg1[%c52] : memref<73xf32, #tpu.memory_space<smem>>
    %337 = vector.extract_strided_slice %294 {offsets = [0, 1, 0], sizes = [1, 8, 8], strides = [1, 1, 1]} : vector<1x9x9xf32> to vector<1x8x8xf32>
    %338 = vector.broadcast %336 : f32 to vector<1x8x8xf32>
    %339 = arith.mulf %338, %337 : vector<1x8x8xf32>
    %340 = arith.addf %320, %339 : vector<1x8x8xf32>
    %c53 = arith.constant 53 : index
    %341 = memref.load %arg1[%c53] : memref<73xf32, #tpu.memory_space<smem>>
    %342 = vector.extract_strided_slice %291 {offsets = [0, 1, 1], sizes = [1, 8, 8], strides = [1, 1, 1]} : vector<1x9x9xf32> to vector<1x8x8xf32>
    %343 = vector.broadcast %341 : f32 to vector<1x8x8xf32>
    %344 = arith.mulf %343, %342 : vector<1x8x8xf32>
    %345 = arith.addf %325, %344 : vector<1x8x8xf32>
    %c0_99 = arith.constant 0 : index
    %c6_100 = arith.constant 6 : index
    %c0_101 = arith.constant 0 : index
    %c0_102 = arith.constant 0 : index
    %346 = vector.load %arg4[%c0_99, %c6_100, %c0_101, %c0_102] : memref<1x8x9x9xbf16, #tpu.memory_space<vmem>>, vector<1x1x9x9xbf16>
    %347 = vector.shape_cast %346 : vector<1x1x9x9xbf16> to vector<1x9x9xbf16>
    %348 = arith.extf %347 : vector<1x9x9xbf16> to vector<1x9x9xf32>
    %c0_103 = arith.constant 0 : index
    %c6_104 = arith.constant 6 : index
    %c0_105 = arith.constant 0 : index
    %c0_106 = arith.constant 0 : index
    %349 = vector.load %arg5[%c0_103, %c6_104, %c0_105, %c0_106] : memref<1x8x9x9xbf16, #tpu.memory_space<vmem>>, vector<1x1x9x9xbf16>
    %350 = vector.shape_cast %349 : vector<1x1x9x9xbf16> to vector<1x9x9xbf16>
    %351 = arith.extf %350 : vector<1x9x9xbf16> to vector<1x9x9xf32>
    %c0_107 = arith.constant 0 : index
    %c6_108 = arith.constant 6 : index
    %c0_109 = arith.constant 0 : index
    %c0_110 = arith.constant 0 : index
    %352 = vector.load %arg6[%c0_107, %c6_108, %c0_109, %c0_110] : memref<1x8x9x9xbf16, #tpu.memory_space<vmem>>, vector<1x1x9x9xbf16>
    %353 = vector.shape_cast %352 : vector<1x1x9x9xbf16> to vector<1x9x9xbf16>
    %354 = arith.extf %353 : vector<1x9x9xbf16> to vector<1x9x9xf32>
    %c0_111 = arith.constant 0 : index
    %c6_112 = arith.constant 6 : index
    %c0_113 = arith.constant 0 : index
    %c0_114 = arith.constant 0 : index
    %355 = vector.load %arg7[%c0_111, %c6_112, %c0_113, %c0_114] : memref<1x8x9x9xbf16, #tpu.memory_space<vmem>>, vector<1x1x9x9xbf16>
    %356 = vector.shape_cast %355 : vector<1x1x9x9xbf16> to vector<1x9x9xbf16>
    %357 = arith.extf %356 : vector<1x9x9xbf16> to vector<1x9x9xf32>
    %c54 = arith.constant 54 : index
    %358 = memref.load %arg1[%c54] : memref<73xf32, #tpu.memory_space<smem>>
    %359 = vector.extract_strided_slice %348 {offsets = [0, 0, 0], sizes = [1, 8, 8], strides = [1, 1, 1]} : vector<1x9x9xf32> to vector<1x8x8xf32>
    %360 = vector.broadcast %358 : f32 to vector<1x8x8xf32>
    %361 = arith.mulf %360, %359 : vector<1x8x8xf32>
    %362 = arith.addf %345, %361 : vector<1x8x8xf32>
    %c55 = arith.constant 55 : index
    %363 = memref.load %arg1[%c55] : memref<73xf32, #tpu.memory_space<smem>>
    %364 = vector.extract_strided_slice %351 {offsets = [0, 0, 0], sizes = [1, 8, 8], strides = [1, 1, 1]} : vector<1x9x9xf32> to vector<1x8x8xf32>
    %365 = vector.broadcast %363 : f32 to vector<1x8x8xf32>
    %366 = arith.mulf %365, %364 : vector<1x8x8xf32>
    %367 = arith.addf %330, %366 : vector<1x8x8xf32>
    %c56 = arith.constant 56 : index
    %368 = memref.load %arg1[%c56] : memref<73xf32, #tpu.memory_space<smem>>
    %369 = vector.extract_strided_slice %348 {offsets = [0, 0, 1], sizes = [1, 8, 8], strides = [1, 1, 1]} : vector<1x9x9xf32> to vector<1x8x8xf32>
    %370 = vector.broadcast %368 : f32 to vector<1x8x8xf32>
    %371 = arith.mulf %370, %369 : vector<1x8x8xf32>
    %372 = arith.addf %335, %371 : vector<1x8x8xf32>
    %c57 = arith.constant 57 : index
    %373 = memref.load %arg1[%c57] : memref<73xf32, #tpu.memory_space<smem>>
    %374 = vector.extract_strided_slice %354 {offsets = [0, 0, 0], sizes = [1, 8, 8], strides = [1, 1, 1]} : vector<1x9x9xf32> to vector<1x8x8xf32>
    %375 = vector.broadcast %373 : f32 to vector<1x8x8xf32>
    %376 = arith.mulf %375, %374 : vector<1x8x8xf32>
    %377 = arith.addf %340, %376 : vector<1x8x8xf32>
    %c58 = arith.constant 58 : index
    %378 = memref.load %arg1[%c58] : memref<73xf32, #tpu.memory_space<smem>>
    %379 = vector.extract_strided_slice %357 {offsets = [0, 0, 0], sizes = [1, 8, 8], strides = [1, 1, 1]} : vector<1x9x9xf32> to vector<1x8x8xf32>
    %380 = vector.broadcast %378 : f32 to vector<1x8x8xf32>
    %381 = arith.mulf %380, %379 : vector<1x8x8xf32>
    %382 = arith.addf %362, %381 : vector<1x8x8xf32>
    %c59 = arith.constant 59 : index
    %383 = memref.load %arg1[%c59] : memref<73xf32, #tpu.memory_space<smem>>
    %384 = vector.extract_strided_slice %354 {offsets = [0, 0, 1], sizes = [1, 8, 8], strides = [1, 1, 1]} : vector<1x9x9xf32> to vector<1x8x8xf32>
    %385 = vector.broadcast %383 : f32 to vector<1x8x8xf32>
    %386 = arith.mulf %385, %384 : vector<1x8x8xf32>
    %387 = arith.addf %367, %386 : vector<1x8x8xf32>
    %c60 = arith.constant 60 : index
    %388 = memref.load %arg1[%c60] : memref<73xf32, #tpu.memory_space<smem>>
    %389 = vector.extract_strided_slice %348 {offsets = [0, 1, 0], sizes = [1, 8, 8], strides = [1, 1, 1]} : vector<1x9x9xf32> to vector<1x8x8xf32>
    %390 = vector.broadcast %388 : f32 to vector<1x8x8xf32>
    %391 = arith.mulf %390, %389 : vector<1x8x8xf32>
    %392 = arith.addf %372, %391 : vector<1x8x8xf32>
    %c61 = arith.constant 61 : index
    %393 = memref.load %arg1[%c61] : memref<73xf32, #tpu.memory_space<smem>>
    %394 = vector.extract_strided_slice %351 {offsets = [0, 1, 0], sizes = [1, 8, 8], strides = [1, 1, 1]} : vector<1x9x9xf32> to vector<1x8x8xf32>
    %395 = vector.broadcast %393 : f32 to vector<1x8x8xf32>
    %396 = arith.mulf %395, %394 : vector<1x8x8xf32>
    %397 = arith.addf %377, %396 : vector<1x8x8xf32>
    %c62 = arith.constant 62 : index
    %398 = memref.load %arg1[%c62] : memref<73xf32, #tpu.memory_space<smem>>
    %399 = vector.extract_strided_slice %348 {offsets = [0, 1, 1], sizes = [1, 8, 8], strides = [1, 1, 1]} : vector<1x9x9xf32> to vector<1x8x8xf32>
    %400 = vector.broadcast %398 : f32 to vector<1x8x8xf32>
    %401 = arith.mulf %400, %399 : vector<1x8x8xf32>
    %402 = arith.addf %382, %401 : vector<1x8x8xf32>
    %c0_115 = arith.constant 0 : index
    %c7_116 = arith.constant 7 : index
    %c0_117 = arith.constant 0 : index
    %c0_118 = arith.constant 0 : index
    %403 = vector.load %arg4[%c0_115, %c7_116, %c0_117, %c0_118] : memref<1x8x9x9xbf16, #tpu.memory_space<vmem>>, vector<1x1x9x9xbf16>
    %404 = vector.shape_cast %403 : vector<1x1x9x9xbf16> to vector<1x9x9xbf16>
    %405 = arith.extf %404 : vector<1x9x9xbf16> to vector<1x9x9xf32>
    %c0_119 = arith.constant 0 : index
    %c7_120 = arith.constant 7 : index
    %c0_121 = arith.constant 0 : index
    %c0_122 = arith.constant 0 : index
    %406 = vector.load %arg5[%c0_119, %c7_120, %c0_121, %c0_122] : memref<1x8x9x9xbf16, #tpu.memory_space<vmem>>, vector<1x1x9x9xbf16>
    %407 = vector.shape_cast %406 : vector<1x1x9x9xbf16> to vector<1x9x9xbf16>
    %408 = arith.extf %407 : vector<1x9x9xbf16> to vector<1x9x9xf32>
    %c0_123 = arith.constant 0 : index
    %c7_124 = arith.constant 7 : index
    %c0_125 = arith.constant 0 : index
    %c0_126 = arith.constant 0 : index
    %409 = vector.load %arg6[%c0_123, %c7_124, %c0_125, %c0_126] : memref<1x8x9x9xbf16, #tpu.memory_space<vmem>>, vector<1x1x9x9xbf16>
    %410 = vector.shape_cast %409 : vector<1x1x9x9xbf16> to vector<1x9x9xbf16>
    %411 = arith.extf %410 : vector<1x9x9xbf16> to vector<1x9x9xf32>
    %c0_127 = arith.constant 0 : index
    %c7_128 = arith.constant 7 : index
    %c0_129 = arith.constant 0 : index
    %c0_130 = arith.constant 0 : index
    %412 = vector.load %arg7[%c0_127, %c7_128, %c0_129, %c0_130] : memref<1x8x9x9xbf16, #tpu.memory_space<vmem>>, vector<1x1x9x9xbf16>
    %413 = vector.shape_cast %412 : vector<1x1x9x9xbf16> to vector<1x9x9xbf16>
    %414 = arith.extf %413 : vector<1x9x9xbf16> to vector<1x9x9xf32>
    %c63 = arith.constant 63 : index
    %415 = memref.load %arg1[%c63] : memref<73xf32, #tpu.memory_space<smem>>
    %416 = vector.extract_strided_slice %405 {offsets = [0, 0, 0], sizes = [1, 8, 8], strides = [1, 1, 1]} : vector<1x9x9xf32> to vector<1x8x8xf32>
    %417 = vector.broadcast %415 : f32 to vector<1x8x8xf32>
    %418 = arith.mulf %417, %416 : vector<1x8x8xf32>
    %419 = arith.addf %402, %418 : vector<1x8x8xf32>
    %c64 = arith.constant 64 : index
    %420 = memref.load %arg1[%c64] : memref<73xf32, #tpu.memory_space<smem>>
    %421 = vector.extract_strided_slice %408 {offsets = [0, 0, 0], sizes = [1, 8, 8], strides = [1, 1, 1]} : vector<1x9x9xf32> to vector<1x8x8xf32>
    %422 = vector.broadcast %420 : f32 to vector<1x8x8xf32>
    %423 = arith.mulf %422, %421 : vector<1x8x8xf32>
    %424 = arith.addf %387, %423 : vector<1x8x8xf32>
    %c65 = arith.constant 65 : index
    %425 = memref.load %arg1[%c65] : memref<73xf32, #tpu.memory_space<smem>>
    %426 = vector.extract_strided_slice %405 {offsets = [0, 0, 1], sizes = [1, 8, 8], strides = [1, 1, 1]} : vector<1x9x9xf32> to vector<1x8x8xf32>
    %427 = vector.broadcast %425 : f32 to vector<1x8x8xf32>
    %428 = arith.mulf %427, %426 : vector<1x8x8xf32>
    %429 = arith.addf %392, %428 : vector<1x8x8xf32>
    %c66 = arith.constant 66 : index
    %430 = memref.load %arg1[%c66] : memref<73xf32, #tpu.memory_space<smem>>
    %431 = vector.extract_strided_slice %411 {offsets = [0, 0, 0], sizes = [1, 8, 8], strides = [1, 1, 1]} : vector<1x9x9xf32> to vector<1x8x8xf32>
    %432 = vector.broadcast %430 : f32 to vector<1x8x8xf32>
    %433 = arith.mulf %432, %431 : vector<1x8x8xf32>
    %434 = arith.addf %397, %433 : vector<1x8x8xf32>
    %c67 = arith.constant 67 : index
    %435 = memref.load %arg1[%c67] : memref<73xf32, #tpu.memory_space<smem>>
    %436 = vector.extract_strided_slice %414 {offsets = [0, 0, 0], sizes = [1, 8, 8], strides = [1, 1, 1]} : vector<1x9x9xf32> to vector<1x8x8xf32>
    %437 = vector.broadcast %435 : f32 to vector<1x8x8xf32>
    %438 = arith.mulf %437, %436 : vector<1x8x8xf32>
    %439 = arith.addf %419, %438 : vector<1x8x8xf32>
    %c68 = arith.constant 68 : index
    %440 = memref.load %arg1[%c68] : memref<73xf32, #tpu.memory_space<smem>>
    %441 = vector.extract_strided_slice %411 {offsets = [0, 0, 1], sizes = [1, 8, 8], strides = [1, 1, 1]} : vector<1x9x9xf32> to vector<1x8x8xf32>
    %442 = vector.broadcast %440 : f32 to vector<1x8x8xf32>
    %443 = arith.mulf %442, %441 : vector<1x8x8xf32>
    %444 = arith.addf %424, %443 : vector<1x8x8xf32>
    %c69 = arith.constant 69 : index
    %445 = memref.load %arg1[%c69] : memref<73xf32, #tpu.memory_space<smem>>
    %446 = vector.extract_strided_slice %405 {offsets = [0, 1, 0], sizes = [1, 8, 8], strides = [1, 1, 1]} : vector<1x9x9xf32> to vector<1x8x8xf32>
    %447 = vector.broadcast %445 : f32 to vector<1x8x8xf32>
    %448 = arith.mulf %447, %446 : vector<1x8x8xf32>
    %449 = arith.addf %429, %448 : vector<1x8x8xf32>
    %c70 = arith.constant 70 : index
    %450 = memref.load %arg1[%c70] : memref<73xf32, #tpu.memory_space<smem>>
    %451 = vector.extract_strided_slice %408 {offsets = [0, 1, 0], sizes = [1, 8, 8], strides = [1, 1, 1]} : vector<1x9x9xf32> to vector<1x8x8xf32>
    %452 = vector.broadcast %450 : f32 to vector<1x8x8xf32>
    %453 = arith.mulf %452, %451 : vector<1x8x8xf32>
    %454 = arith.addf %434, %453 : vector<1x8x8xf32>
    %c71 = arith.constant 71 : index
    %455 = memref.load %arg1[%c71] : memref<73xf32, #tpu.memory_space<smem>>
    %456 = vector.extract_strided_slice %405 {offsets = [0, 1, 1], sizes = [1, 8, 8], strides = [1, 1, 1]} : vector<1x9x9xf32> to vector<1x8x8xf32>
    %457 = vector.broadcast %455 : f32 to vector<1x8x8xf32>
    %458 = arith.mulf %457, %456 : vector<1x8x8xf32>
    %459 = arith.addf %439, %458 : vector<1x8x8xf32>
    %c72 = arith.constant 72 : index
    %460 = memref.load %arg1[%c72] : memref<73xf32, #tpu.memory_space<smem>>
    %461 = arith.addf %459, %444 : vector<1x8x8xf32>
    %462 = arith.addf %449, %454 : vector<1x8x8xf32>
    %463 = arith.addf %461, %462 : vector<1x8x8xf32>
    %464 = vector.broadcast %460 : f32 to vector<1x8x8xf32>
    %465 = arith.addf %463, %464 : vector<1x8x8xf32>
    %cst_131 = arith.constant 0.000000e+00 : f32
    %466 = vector.broadcast %cst_131 : f32 to vector<1x8x8xf32>
    %467 = arith.maximumf %465, %466 : vector<1x8x8xf32>
    %c0_132 = arith.constant 0 : index
    %c0_133 = arith.constant 0 : index
    %468 = vector.load %arg3[%c0_132, %c0_133] : memref<8x16xf32, #tpu.memory_space<vmem>>, vector<8x16xf32>
    %cst_134 = arith.constant dense<0.000000e+00> : vector<1x8x16xf32>
    %469 = tpu.matmul %467, %468, %cst_134 {dimension_numbers = #tpu.dot_dimension_numbers<[2], [0], [0, 1], [1], [0, 0, 0, 1, 1, 1], [], []>} : vector<1x8x8xf32>, vector<8x16xf32>, vector<1x8x16xf32> -> vector<1x8x16xf32>
    %c0_135 = arith.constant 0 : index
    %c0_136 = arith.constant 0 : index
    %470 = vector.load %arg2[%c0_135, %c0_136] : memref<16x8xf32, #tpu.memory_space<vmem>>, vector<16x8xf32>
    %471 = vector.shape_cast %470 : vector<16x8xf32> to vector<1x16x8xf32>
    %cst_137 = arith.constant dense<0.000000e+00> : vector<1x16x16xf32>
    %472 = tpu.matmul %471, %469, %cst_137 {dimension_numbers = #tpu.dot_dimension_numbers<[2], [1], [1], [2], [0, 0, 0, 1, 1, 2], [0], [0]>} : vector<1x16x8xf32>, vector<1x8x16xf32>, vector<1x16x16xf32> -> vector<1x16x16xf32>
    %c0_138 = arith.constant 0 : index
    %c0_139 = arith.constant 0 : index
    %c0_140 = arith.constant 0 : index
    %473 = vector.load %arg8[%c0_138, %c0_139, %c0_140] : memref<1x16x16xf32, #tpu.memory_space<vmem>>, vector<1x16x16xf32>
    tpu.vector_store %arg8[%c0_138, %c0_139, %c0_140], %472 {strides = array<i32>} : memref<1x16x16xf32, #tpu.memory_space<vmem>>, vector<1x16x16xf32>,
    return
  }
  func.func @transform_0(%arg0: i32) -> i32 {
    %c0_i32 = arith.constant 0 : i32
    %c0_i32_0 = arith.constant 0 : i32
    return %c0_i32 : i32
  }
  func.func @transform_1(%arg0: i32) -> (i32, i32) {
    %c0_i32 = arith.constant 0 : i32
    %c0_i32_0 = arith.constant 0 : i32
    %c0_i32_1 = arith.constant 0 : i32
    return %c0_i32, %c0_i32_0 : i32, i32
  }
  func.func @transform_2(%arg0: i32) -> (i32, i32) {
    %c0_i32 = arith.constant 0 : i32
    %c0_i32_0 = arith.constant 0 : i32
    %c0_i32_1 = arith.constant 0 : i32
    return %c0_i32, %c0_i32_0 : i32, i32
  }
  func.func @transform_3(%arg0: i32) -> (i32, i32, i32, i32) {
    %c0_i32 = arith.constant 0 : i32
    %c0_i32_0 = arith.constant 0 : i32
    %c0_i32_1 = arith.constant 0 : i32
    %c0_i32_2 = arith.constant 0 : i32
    return %arg0, %c0_i32, %c0_i32_0, %c0_i32_1 : i32, i32, i32, i32
  }
  func.func @transform_4(%arg0: i32) -> (i32, i32, i32, i32) {
    %c0_i32 = arith.constant 0 : i32
    %c0_i32_0 = arith.constant 0 : i32
    %c0_i32_1 = arith.constant 0 : i32
    %c0_i32_2 = arith.constant 0 : i32
    return %arg0, %c0_i32, %c0_i32_0, %c0_i32_1 : i32, i32, i32, i32
  }
  func.func @transform_5(%arg0: i32) -> (i32, i32, i32, i32) {
    %c0_i32 = arith.constant 0 : i32
    %c0_i32_0 = arith.constant 0 : i32
    %c0_i32_1 = arith.constant 0 : i32
    %c0_i32_2 = arith.constant 0 : i32
    return %arg0, %c0_i32, %c0_i32_0, %c0_i32_1 : i32, i32, i32, i32
  }
  func.func @transform_6(%arg0: i32) -> (i32, i32, i32, i32) {
    %c0_i32 = arith.constant 0 : i32
    %c0_i32_0 = arith.constant 0 : i32
    %c0_i32_1 = arith.constant 0 : i32
    %c0_i32_2 = arith.constant 0 : i32
    return %arg0, %c0_i32, %c0_i32_0, %c0_i32_1 : i32, i32, i32, i32
  }
  func.func @transform_7(%arg0: i32) -> (i32, i32, i32) {
    %c0_i32 = arith.constant 0 : i32
    %c0_i32_0 = arith.constant 0 : i32
    %c0_i32_1 = arith.constant 0 : i32
    return %arg0, %c0_i32, %c0_i32_0 : i32, i32, i32
  }
}

</mosaic_0001>

<bundles_post_ra>
// kernel: label_decoder_forward.1
= control target key start
LH: loop header
LB: loop body
LE: loop exit
PB: predicated region body
PF: predicated region fallthrough
CT: control target
= control target key end

     0   :  { %12 = vsyncpa [#allocation4], 0  ;;  %s2232_s0 = inlined_call_operand.vmem [shape: f32[73], index: 0, kind: input, shape index: {}]   ;;  %s2233_s1 = inlined_call_operand.vmem [shape: f32[16,8], index: 1, kind: input, shape index: {}]   ;;  %s2234_s2 = inlined_call_operand.vmem [shape: f32[8,16], index: 2, kind: input, shape index: {}]   ;;  %s2235_s3 = inlined_call_operand.vmem [shape: bf16[4,8,9,9], index: 3, kind: input, shape index: {}]   ;;  %s2236_s4 = inlined_call_operand.vmem [shape: bf16[4,8,9,9], index: 4, kind: input, shape index: {}]   ;;  %s2237_s5 = inlined_call_operand.vmem [shape: bf16[4,8,9,9], index: 5, kind: input, shape index: {}]   ;;  %s2238_s6 = inlined_call_operand.vmem [shape: bf16[4,8,9,9], index: 6, kind: input, shape index: {}]   ;;  %s2239_s7 = inlined_call_operand.hbm [shape: f32[4,16,16], index: 7, kind: output, shape index: {}]  }
   0x1   :  { %13 = vsyncpa [#allocation3], 0 }
   0x2   :  { %15 = vsyncpa [#allocation3 + $0x1], 0  ;;  %s1638_s24 = smov 0   ;;  %s1640_s25 = smov 0  }
   0x3   :  { %s1642_s26 = smov 0   ;;  %s1644_s27 = smov 0  }
   0x4 LB: > { %s1659_s28 = sadd.s32 4294967295, %s1588_s27   ;;  %s1296_s29 = sadd.s32 4294967294, %s1588_s27   ;;  %s1588_s27 = sphi %s1644_s27, %s2256_s27   ;;  %s1584_s26 = sphi %s1642_s26, %s2255_s26   ;;  %s1580_s25 = sphi %s1640_s25, %s2254_s25   ;;  %s1576_s24 = sphi %s1638_s24, %s2253_s24  }
   0x5   : > { %s1663_s30 = sadd.s32 1, %s1588_s27   ;;  %s195_s8 = sadd.s32 1, %s1584_s26 }
   0x6   : > { %s192_s9 = ssub.s32 %s1588_s27, %s1663_s30  ;;  %p205_p0 = scmp.ne.s32.totalorder %s1584_s26, %s1580_s25 }
   0x7   : > { %p193_p1 = scmp.eq.s32.totalorder %s192_s9, 0  ;;  %p206_p2 = scmp.eq.s32.totalorder %s1659_s28, 3 }
   0x8   : > { %p211_p3 = scmp.ne.s32.totalorder %s1580_s25, %s1576_s24  ;;  %p212_p4 = scmp.eq.s32.totalorder %s1296_s29, 3 }
   0x9   : > { %s1674_s10 = scalar_select %p193_p1, %s1584_s26, %s195_s8  }
   0xa   : > { %p1676_p5 = por %p206_p2, %p205_p0  ;;  %p1680_p6 = por %p212_p4, %p211_p3 }
   0xb   : > { %p1297_p7 = scmp.ge.s32.totalorder %s1588_s27, 1  ;;  %p219_p8 = scmp.lt.s32.totalorder %s1588_s27, 5 }
   0xc   : > { %p1467_p9 = scmp.eq.s32.totalorder %s1659_s28, 0  ;;  %s232_s16 = sshll.u32 %s2232_s0, 4  ;;  %s233_s16 = int_to_ptr.vmem [resolvable:$true] %s232_s16 }
   0xd   : > { %p1687_p10 = pnand %p1297_p7, %p219_p8  ;;  %s1509_s17 = scalar_lea.vmem %s233_s16, 16 }
   0xe   : > { %p1510_p13 = scmp.ne.s32.totalorder %s233_s16, %s1509_s17  ;;  %p1517_p3 = scmp.lt.s32.totalorder %s233_s16, %s233_s16 }
   0xf   : > { %p1459_p11 = pneg %p1687_p10  ;;  %p1518_p4 = scmp.lt.s32.totalorder %s1509_s17, %s1509_s17 }
  0x11   : > { %p1460_p12 = pnand %p1467_p9, %p1459_p11  ;;  %p1519_p7 = por %p1518_p4, %p1517_p3 }
  0x13   : > { %p1511_p0 = pneg %p1460_p12 }
  0x15   : > { %p1512_p1 = pnand %p1511_p0, %p1510_p13 }
  0x17   : > { %p1513_p2 = pneg %p1512_p1 }
  0x19   : > { %p1520_p8 = pnand %p1519_p7, %p1513_p2 }
  0x1b   : > { %1523 = shalt.err (!%p1520_p8)
}
  0x1c   : > { %s1590_s18 = smov [#allocation2]   ;;  %283 = sbr.rel (%p1687_p10) target bundleno = 736 (0x2e0), region = 48 }
  0x1d   : > { %1462 = dma.vmem_to_smem (!%p1460_p12), %s233_s16, 16, %s1590_s18, [#allocation4]  }
  0x21   : > { %1567 = dma.done.wait (%p1467_p9), [#allocation4], 16  }
  0x22   : > { %1569 = vsyncadd (%p1467_p9), [#allocation4], 4294967280 }
  0x23   : > { %289 = sfence }
  0x24   : > { %p331_p11 = scmp.lt.s32.totalorder %s1659_s28, 3  ;;  %s1316_s19 = sld [smem:[#allocation2 + $0x6]]  ;;  %vm397_vm0 = vcmask 1046528   ;;  %vm1594_vm1 = vmmov 0   ;;  %vm1012_vm2 = vcmask 64512   ;;  %vm1169_vm3 = vcmask 130048  }
  0x25   : > { %s1331_s20 = sld [smem:[#allocation2 + $0xf]] }
  0x26   : > { %s332_s21 = scalar_select %p331_p11, %s1659_s28, 3 }
  0x27   : > { %s1706_s22 = sld [smem:[#allocation2 + $0x18]] }
  0x28   : > { %s1708_s23 = sshll.u32 %s332_s21, 6  ;;  %s1710_s29 = sld [smem:[#allocation2 + $0x21]] }
  0x29   : > { %s1716_s13 = scalar_lea.vmem %s2235_s3, %s1708_s23  ;;  %s1718_s14 = sld [smem:[#allocation2 + $0x2a]] }
  0x2a   : > { %v351_v0 = vld [vmem:[%s1716_s13] ss:$8 sps:$4 sm:$0xff]   ;;  %v1722_v1 = vld [vmem:[%s1716_s13 + $0x4] sm:$0x1]  ;;  %v392_v2 = vstv %s1316_s19  ;;  %v1725_v3 = vld [vmem:[%s1716_s13 + $0xc] sm:$0x1] }
  0x2b   : > { %v1727_v4 = vunpack.c.l.bf16 %v351_v0  ;;  %v354_v5 = vunpack.c.l.bf16 %v1722_v1  ;;  %v1730_v6 = vunpack.c.h.bf16 %v351_v0  ;;  %v433_v7 = vunpack.c.l.bf16 %v1725_v3  ;;  %v1334_v8 = vld [vmem:[%s1716_s13 + $0x10] ss:$8 sps:$4 sm:$0xff]   ;;  %v1735_v9 = vld [vmem:[%s1716_s13 + $0x14] sm:$0x1]  ;;  %v1738_v10 = vld [vmem:[%s1716_s13 + $0x1c] sm:$0x1] }
  0x2c   : > { %v474_v11 = vstv %s1331_s20  ;;  %v1740_v12 = vunpack.c.l.bf16 %v1334_v8  ;;  %v514_v13 = vunpack.c.l.bf16 %v1735_v9  ;;  %v1743_v14 = vunpack.c.h.bf16 %v1334_v8  ;;  %v1364_v15 = vld [vmem:[%s1716_s13 + $0x20] ss:$8 sps:$4 sm:$0xff]   ;;  %s1752_s15 = sld [smem:[#allocation2 + $0x33]]  ;;  %v1758_v23 = vld [vmem:[%s1716_s13 + $0x24] sm:$0x1]  ;;  %s1784_s20 = scalar_lea.vmem %s2236_s4, %s1708_s23 }
  0x2d   : > { %v393_v16 = vmul.f32 %v392_v2, %v1727_v4  ;;  %v394_v17 = vmul.f32 %v392_v2, %v354_v5  ;;  %v475_v18 = vmul.f32 %v474_v11, %v1730_v6  ;;  %v476_v19 = vmul.f32 %v474_v11, %v433_v7  ;;  %s1762_s16 = sld [smem:[#allocation2 + $0x3c]]  ;;  %v1771_v33 = vld [vmem:[%s1716_s13 + $0x2c] sm:$0x1]  ;;  %v1394_v38 = vld [vmem:[%s1716_s13 + $0x30] ss:$8 sps:$4 sm:$0xff]  }
  0x2e   : > { %v555_v20 = vstv %s1706_s22  ;;  %v595_v21 = vunpack.c.l.bf16 %v1738_v10  ;;  %v636_v22 = vstv %s1710_s29  ;;  %v1760_v24 = vunpack.c.l.bf16 %v1364_v15  ;;  %s1773_s17 = sld [smem:[#allocation2 + $0x45]]  ;;  %s1591_s22 = smov 1   ;;  %v1798_v47 = vld [vmem:[%s1716_s13 + $0x34] sm:$0x1]  ;;  %v1801_v48 = vld [vmem:[%s1716_s13 + $0x3c] sm:$0x1] }
  0x2f   : > { %v398_v25 = vrot.slane %v393_v16, 1  ;;  %v399_v26 = vrot.slane %v394_v17, 1  ;;  %v479_v27 = vrot.slane %v475_v18, 1  ;;  %v480_v28 = vrot.slane %v476_v19, 1  ;;  %s1786_s21 = sld [smem:[#allocation2 + $0x3]] }
  0x30   : > { %v556_v29 = vmul.f32 %v555_v20, %v1740_v12  ;;  %v557_v30 = vmul.f32 %v555_v20, %v514_v13  ;;  %v637_v31 = vmul.f32 %v636_v22, %v1743_v14  ;;  %v638_v32 = vmul.f32 %v636_v22, %v595_v21  ;;  %s1789_s29 = sld [smem:[#allocation2 + $0x7]]  ;;  %v1815_v53 = vld [vmem:[%s1784_s20] ss:$8 sps:$4 sm:$0xff]   ;;  %v356_v58 = vld [vmem:[%s1784_s20 + $0x4] sm:$0x1] }
  0x31   : > { %v400_v34 = vsel %vm397_vm0, %v398_v25, %v399_v26  ;;  %v481_v35 = vsel %vm397_vm0, %v479_v27, %v480_v28  ;;  %v676_v36 = vunpack.c.l.bf16 %v1758_v23  ;;  %v717_v37 = vstv %s1718_s14  ;;  %s1812_s14 = scalar_lea.vmem %s2237_s5, %s1708_s23  ;;  %s1822_s13 = sld [smem:[#allocation2 + $0xc]]  ;;  %v1322_v26 = vld [vmem:[%s1784_s20 + $0xc] sm:$0x1] }
  0x32   : > { %401 = vrot.lane.b32.xlu0 %v400_v34, %s1591_s22  ;;  %v560_v39 = vrot.slane %v556_v29, 1  ;;  %v561_v40 = vrot.slane %v557_v30, 1  ;;  %v641_v41 = vrot.slane %v637_v31, 1  ;;  %v642_v42 = vrot.slane %v638_v32, 1  ;;  %v1835_v11 = vld [vmem:[%s1812_s14] ss:$8 sps:$4 sm:$0xff]  }
  0x33   : > { %v718_v43 = vmul.f32 %v717_v37, %v1760_v24  ;;  %v719_v44 = vmul.f32 %v717_v37, %v676_v36  ;;  %v1794_v45 = vunpack.c.h.bf16 %v1364_v15  ;;  %v757_v46 = vunpack.c.l.bf16 %v1771_v33  ;;  %s1837_s18 = sld [smem:[#allocation2 + $0x15]]  ;;  %v1856_v31 = vld [vmem:[%s1784_s20 + $0x10] ss:$8 sps:$4 sm:$0xff]  }
  0x34   : > { %v562_v49 = vsel %vm397_vm0, %v560_v39, %v561_v40  ;;  %v643_v50 = vsel %vm397_vm0, %v641_v41, %v642_v42  ;;  %v798_v51 = vstv %s1752_s15  ;;  %v1806_v52 = vunpack.c.l.bf16 %v1394_v38  ;;  %s1830_s15 = sld [smem:[#allocation2 + $0x10]] }
  0x35   : > { %563 = vrot.lane.b32.xlu1 %v562_v49, %s1591_s22  ;;  %v722_v54 = vrot.slane %v718_v43, 1  ;;  %v723_v55 = vrot.slane %v719_v44, 1  ;;  %v799_v56 = vmul.f32 %v798_v51, %v1794_v45  ;;  %v800_v57 = vmul.f32 %v798_v51, %v757_v46  ;;  %s1867_s19 = sld [smem:[#allocation2 + $0x22]]  ;;  %v1873_v51 = vld [vmem:[%s1812_s14 + $0x10] ss:$8 sps:$4 sm:$0xff]  }
  0x36   : > { %482 = vrot.lane.b32.xlu0 %v481_v35, %s1591_s22  ;;  %v838_v59 = vunpack.c.l.bf16 %v1798_v47  ;;  %v879_v60 = vstv %s1762_s16  ;;  %v1827_v61 = vunpack.c.h.bf16 %v1394_v38  ;;  %v919_v62 = vunpack.c.l.bf16 %v1801_v48  ;;  %s1843_s16 = sld [smem:[#allocation2 + $0x19]]  ;;  %v1337_v38 = vld [vmem:[%s1784_s20 + $0x14] sm:$0x1] }
  0x37   : > { %v724_v63 = vsel %vm397_vm0, %v722_v54, %v723_v55  ;;  %v803_v0 = vrot.slane %v799_v56, 1  ;;  %v804_v2 = vrot.slane %v800_v57, 1  ;;  %v880_v8 = vmul.f32 %v879_v60, %v1806_v52  ;;  %s1898_s8 = sld [smem:[#allocation2 + $0x30]] }
  0x38   : > { %v881_v15 = vmul.f32 %v879_v60, %v838_v59  ;;  %v960_v16 = vstv %s1773_s17  ;;  %v357_v17 = vunpack.c.l.bf16 %v1815_v53  ;;  %v358_v18 = vunpack.c.l.bf16 %v356_v58  ;;  %s1861_s17 = sld [smem:[#allocation2 + $0x1e]] }
  0x39   : > { %644 = vrot.lane.b32.xlu1 %v643_v50, %s1591_s22  ;;  %v805_v19 = vsel %vm397_vm0, %v803_v0, %v804_v2  ;;  %v884_v20 = vrot.slane %v880_v8, 1  ;;  %v961_v22 = vmul.f32 %v960_v16, %v1827_v61  ;;  %v962_v25 = vmul.f32 %v960_v16, %v919_v62  ;;  %v1352_v2 = vld [vmem:[%s1784_s20 + $0x1c] sm:$0x1]  ;;  %s1903_s9 = sld [smem:[#allocation2 + $0x34]] }
  0x3a   : > { %725 = vrot.lane.b32.xlu0 %v724_v63, %s1591_s22  ;;  %v885_v27 = vrot.slane %v881_v15, 1  ;;  %v360_v28 = vunpack.c.l.bf16 %v1835_v11  ;;  %v376_v29 = vstv %s1786_s21  ;;  %v406_v30 = vstv %s1789_s29  ;;  %s1879_s21 = sld [smem:[#allocation2 + $0x27]] }
  0x3b   : > { %v965_v32 = vrot.slane %v961_v22, 1  ;;  %v966_v34 = vrot.slane %v962_v25, 1  ;;  %v407_v35 = vmul.f32 %v406_v30, %v357_v17  ;;  %v408_v37 = vmul.f32 %v406_v30, %v358_v18  ;;  %s1887_s29 = sld [smem:[#allocation2 + $0x2b]] }
  0x3c   : > { %v886_v39 = vsel %vm397_vm0, %v884_v20, %v885_v27  ;;  %v377_v40 = vmul.f32 %v376_v29, %v360_v28  ;;  %v437_v41 = vunpack.c.h.bf16 %v1815_v53  ;;  %v438_v42 = vunpack.c.l.bf16 %v1322_v26  ;;  %v1896_v26 = vld [vmem:[%s1784_s20 + $0x20] ss:$8 sps:$4 sm:$0xff]  }
  0x3d   : > { %806 = vrot.lane.b32.xlu1 %v805_v19, %s1591_s22  ;;  %v967_v43 = vsel %vm397_vm0, %v965_v32, %v966_v34  ;;  %v411_v44 = vrot.slane %v407_v35, 1  ;;  %v412_v49 = vrot.slane %v408_v37, 1  ;;  %v441_v50 = vunpack.c.h.bf16 %v1835_v11 }
  0x3e   : > { %887 = vrot.lane.b32.xlu0 %v886_v39, %s1591_s22  ;;  %v458_v54 = vstv %s1822_s13  ;;  %v487_v55 = vstv %s1830_s15  ;;  %v2244_v56 = vunpack.c.l.bf16 %v1856_v31  ;;  %v519_v57 = vunpack.c.l.bf16 %v1337_v38  ;;  %v1367_v39 = vld [vmem:[%s1784_s20 + $0x24] sm:$0x1]  ;;  %s1919_s13 = sld [smem:[#allocation2 + $0x3d]] }
  0x3f   : > { %v413_v58 = vsel %vm397_vm0, %v411_v44, %v412_v49  ;;  %v459_v60 = vmul.f32 %v458_v54, %v441_v50  ;;  %v488_v63 = vmul.f32 %v487_v55, %v437_v41  ;;  %v489_v0 = vmul.f32 %v487_v55, %v438_v42  ;;  %s1924_s15 = sld [smem:[#allocation2 + $0x39]] }
  0x40   : > { %v415_v8 = vadd.f32 %v413_v58, %v377_v40  ;;  %v522_v15 = vunpack.c.l.bf16 %v1873_v51  ;;  %v539_v16 = vstv %s1837_s18  ;;  %v568_v18 = vstv %s1843_s16  ;;  %v1909_v40 = vld [vmem:[%s1812_s14 + $0x20] ss:$8 sps:$4 sm:$0xff]   ;;  %s1935_s18 = sld [smem:[#allocation2 + $0x46]] }
  0x41   : > { %968 = vrot.lane.b32.xlu1 %v967_v43, %s1591_s22  ;;  %v492_v19 = vrot.slane %v488_v63, 1  ;;  %v493_v20 = vrot.slane %v489_v0, 1  ;;  %v569_v22 = vmul.f32 %v568_v18, %v2244_v56  ;;  %v570_v25 = vmul.f32 %v568_v18, %v519_v57  ;;  %s1941_s16 = sld [smem:[#allocation2 + $0x8]] }
  0x42   : > { %v460_v27 = vadd.f32 %v459_v60, %v415_v8  ;;  %v540_v29 = vmul.f32 %v539_v16, %v522_v15  ;;  %v2243_v30 = vunpack.c.h.bf16 %v1856_v31  ;;  %v600_v32 = vunpack.c.l.bf16 %v1352_v2  ;;  %v1382_v8 = vld [vmem:[%s1784_s20 + $0x2c] sm:$0x1] }
  0x43   : > { %v494_v34 = vsel %vm397_vm0, %v492_v19, %v493_v20  ;;  %v573_v35 = vrot.slane %v569_v22, 1  ;;  %v574_v37 = vrot.slane %v570_v25, 1  ;;  %v603_v38 = vunpack.c.h.bf16 %v1873_v51 }
  0x44   : > { %v496_v42 = vadd.f32 %v494_v34, %v460_v27  ;;  %v620_v43 = vstv %s1861_s17  ;;  %v649_v44 = vstv %s1867_s19  ;;  %v2241_v49 = vunpack.c.l.bf16 %v1896_v26  ;;  %s1947_s17 = sld [smem:[#allocation2 + $0x42]] }
  0x45   : > { %v575_v54 = vsel %vm397_vm0, %v573_v35, %v574_v37  ;;  %v621_v55 = vmul.f32 %v620_v43, %v603_v38  ;;  %v650_v57 = vmul.f32 %v649_v44, %v2243_v30  ;;  %v651_v58 = vmul.f32 %v649_v44, %v600_v32  ;;  %v1933_v32 = vld [vmem:[%s1784_s20 + $0x30] ss:$8 sps:$4 sm:$0xff]   ;;  %s1952_s19 = sld [smem:[#allocation2 + $0x11]] }
  0x46   : > { %v541_v60 = vadd.f32 %v540_v29, %v496_v42  ;;  %v681_v63 = vunpack.c.l.bf16 %v1367_v39  ;;  %v684_v0 = vunpack.c.l.bf16 %v1909_v40  ;;  %v701_v2 = vstv %s1879_s21  ;;  %v1397_v42 = vld [vmem:[%s1784_s20 + $0x34] sm:$0x1]  ;;  %s1980_s21 = sld [smem:[#allocation2 + $0x23]] }
  0x47   : > { %v654_v16 = vrot.slane %v650_v57, 1  ;;  %v655_v18 = vrot.slane %v651_v58, 1  ;;  %v730_v19 = vstv %s1887_s29  ;;  %v2240_v20 = vunpack.c.h.bf16 %v1896_v26  ;;  %v1945_v58 = vld [vmem:[%s1812_s14 + $0x30] ss:$8 sps:$4 sm:$0xff]   ;;  %s1958_s14 = sld [smem:[#allocation2 + $0x1a]] }
  0x48   : > { %v577_v22 = vadd.f32 %v575_v54, %v541_v60  ;;  %v702_v25 = vmul.f32 %v701_v2, %v684_v0  ;;  %v731_v27 = vmul.f32 %v730_v19, %v2241_v49  ;;  %v732_v29 = vmul.f32 %v730_v19, %v681_v63  ;;  %v1412_v19 = vld [vmem:[%s1784_s20 + $0x3c] sm:$0x1]  ;;  %s1971_s20 = sld [smem:[#allocation2 + $0xe]] }
  0x49   : > { %v656_v34 = vsel %vm397_vm0, %v654_v16, %v655_v18  ;;  %v762_v35 = vunpack.c.l.bf16 %v1382_v8  ;;  %v765_v37 = vunpack.c.h.bf16 %v1909_v40  ;;  %v782_v39 = vstv %s1898_s8  ;;  %s1985_s29 = sld [smem:[#allocation2 + $0x17]] }
  0x4a   : > { %v622_v43 = vadd.f32 %v621_v55, %v577_v22  ;;  %v735_v44 = vrot.slane %v731_v27, 1  ;;  %v736_v54 = vrot.slane %v732_v29, 1  ;;  %v811_v57 = vstv %s1903_s9  ;;  %s1992_s8 = sld [smem:[#allocation2 + $0x5]] }
  0x4b   : > { %v812_v60 = vmul.f32 %v811_v57, %v2240_v20  ;;  %v813_v63 = vmul.f32 %v811_v57, %v762_v35  ;;  %v2242_v2 = vunpack.c.l.bf16 %v1933_v32  ;;  %v783_v16 = vmul.f32 %v782_v39, %v765_v37  ;;  %s1998_s9 = sld [smem:[#allocation2 + $0x2c]] }
  0x4c   : > { %v658_v8 = vadd.f32 %v656_v34, %v622_v43  ;;  %v737_v55 = vsel %vm397_vm0, %v735_v44, %v736_v54  ;;  %v843_v18 = vunpack.c.l.bf16 %v1397_v42  ;;  %v846_v29 = vunpack.c.l.bf16 %v1945_v58 }
  0x4d   : > { %v816_v22 = vrot.slane %v812_v60, 1  ;;  %v817_v27 = vrot.slane %v813_v63, 1  ;;  %v892_v35 = vstv %s1919_s13  ;;  %v863_v20 = vstv %s1924_s15  ;;  %s1592_s13 = smov 127   ;;  %s1393_s15 = sld [smem:[#allocation2 + $0x35]] }
  0x4e   : > { %v703_v57 = vadd.f32 %v702_v25, %v658_v8  ;;  %v893_v34 = vmul.f32 %v892_v35, %v2242_v2  ;;  %v894_v43 = vmul.f32 %v892_v35, %v843_v18  ;;  %v923_v39 = vunpack.c.h.bf16 %v1933_v32 }
  0x4f   : > { %v924_v42 = vunpack.c.l.bf16 %v1412_v19  ;;  %v818_v60 = vsel %vm397_vm0, %v816_v22, %v817_v27  ;;  %v864_v63 = vmul.f32 %v863_v20, %v846_v29  ;;  %v973_v25 = vstv %s1935_s18  ;;  %s2003_s18 = sld [smem:[#allocation2 + $0x20]] }
  0x50   : > { %v739_v44 = vadd.f32 %v737_v55, %v703_v57  ;;  %v897_v54 = vrot.slane %v893_v34, 1  ;;  %v898_v49 = vrot.slane %v894_v43, 1  ;;  %v417_v8 = vstv %s1941_s16  ;;  %s2006_s16 = sld [smem:[#allocation2 + $0x3e]] }
  0x51   : > { %v927_v18 = vunpack.c.h.bf16 %v1945_v58  ;;  %v974_v19 = vmul.f32 %v973_v25, %v923_v39  ;;  %v975_v55 = vmul.f32 %v973_v25, %v924_v42  ;;  %v944_v35 = vstv %s1947_s17  ;;  %s1357_s17 = sld [smem:[#allocation2 + $0x1d]] }
  0x52   : > { %v784_v2 = vadd.f32 %v783_v16, %v739_v44  ;;  %v418_v57 = vmul.f32 %v417_v8, %v1727_v4  ;;  %v419_v22 = vmul.f32 %v417_v8, %v354_v5  ;;  %v899_v27 = vsel %vm397_vm0, %v897_v54, %v898_v49 }
  0x53   : > { %v498_v34 = vstv %s1952_s19  ;;  %v579_v43 = vstv %s1958_s14  ;;  %v978_v16 = vrot.slane %v974_v19, 1  ;;  %v979_v44 = vrot.slane %v975_v55, 1  ;;  %s2021_s14 = scalar_lea.vmem %s2238_s6, %s1708_s23  ;;  %s2047_s23 = sld [smem:[#allocation2 + $0x29]] }
  0x54   : > { %v820_v20 = vadd.f32 %v818_v60, %v784_v2  ;;  %v422_v30 = vrot.slane %v418_v57, 1  ;;  %v423_v56 = vrot.slane %v419_v22, 1  ;;  %v945_v25 = vmul.f32 %v944_v35, %v927_v18  ;;  %s1372_s19 = sld [smem:[#allocation2 + $0x26]] }
  0x55   : > { %v580_v1 = vmul.f32 %v579_v43, %v1740_v12  ;;  %v581_v5 = vmul.f32 %v579_v43, %v514_v13  ;;  %v499_v2 = vmul.f32 %v498_v34, %v1730_v6  ;;  %v500_v54 = vmul.f32 %v498_v34, %v433_v7 }
  0x56   : > { %v865_v42 = vadd.f32 %v864_v63, %v820_v20  ;;  %v424_v49 = vsel %vm397_vm0, %v422_v30, %v423_v56  ;;  %v980_v13 = vsel %vm397_vm0, %v978_v16, %v979_v44  ;;  %v466_v56 = vstv %s1971_s20  ;;  %s2023_s20 = sld [smem:[#allocation2]] }
  0x57   : > { %425 = vrot.lane.b32.xlu1 %v424_v49, %s1592_s13  ;;  %v584_v63 = vrot.slane %v580_v1, 1  ;;  %v585_v9 = vrot.slane %v581_v5, 1  ;;  %v503_v7 = vrot.slane %v499_v2, 1  ;;  %v504_v8 = vrot.slane %v500_v54, 1 }
  0x58   : > { %v901_v60 = vadd.f32 %v899_v27, %v865_v42  ;;  %v660_v19 = vstv %s1980_s21  ;;  %v467_v35 = vmul.f32 %v466_v56, %v441_v50  ;;  %v547_v57 = vstv %s1985_s29  ;;  %s2027_s21 = sld [smem:[#allocation2 + $0x4]]  ;;  %v2038_v42 = vld [vmem:[%s2021_s14] ss:$8 sps:$4 sm:$0xff]  }
  0x59   : > { %v586_v3 = vsel %vm397_vm0, %v584_v63, %v585_v9  ;;  %v661_v22 = vmul.f32 %v660_v19, %v1743_v14  ;;  %v662_v20 = vmul.f32 %v660_v19, %v595_v21  ;;  %v505_v27 = vsel %vm397_vm0, %v503_v7, %v504_v8  ;;  %s1390_s29 = sld [smem:[#allocation2 + $0x32]] }
  0x5a   : > { %v946_v30 = vadd.f32 %v945_v25, %v901_v60  ;;  %v384_v50 = vstv %s1992_s8  ;;  %v548_v10 = vmul.f32 %v547_v57, %v522_v15  ;;  %v741_v21 = vstv %s1998_s9  ;;  %s1423_s8 = sld [smem:[#allocation2 + $0x47]] }
  0x5b   : > { %587 = vrot.lane.b32.xlu1 %v586_v3, %s1592_s13  ;;  %v822_v34 = vstv %s1393_s15  ;;  %v628_v43 = vstv %s2003_s18  ;;  %v385_v25 = vmul.f32 %v384_v50, %v360_v28  ;;  %v665_v1 = vrot.slane %v661_v22, 1  ;;  %s1405_s9 = sld [smem:[#allocation2 + $0x3b]] }
  0x5c   : > { %v982_v55 = vadd.f32 %v980_v13, %v946_v30  ;;  %v823_v16 = vmul.f32 %v822_v34, %v1794_v45  ;;  %v824_v44 = vmul.f32 %v822_v34, %v757_v46  ;;  %v666_v5 = vrot.slane %v662_v20, 1  ;;  %s1312_s15 = sld [smem:[#allocation2 + $0x2]] }
  0x5d   : > { %v903_v49 = vstv %s2006_s16  ;;  %v742_v15 = vmul.f32 %v741_v21, %v1760_v24  ;;  %v743_v2 = vmul.f32 %v741_v21, %v676_v36  ;;  %v629_v33 = vmul.f32 %v628_v43, %v603_v38  ;;  %s1327_s18 = sld [smem:[#allocation2 + $0xb]] }
  0x5e   : > { %999 = vrot.lane.b32.xlu0 %v982_v55, %s1591_s22  ;;  %v362_v46 = vunpack.c.l.bf16 %v2038_v42  ;;  %v827_v11 = vrot.slane %v823_v16, 1  ;;  %v828_v28 = vrot.slane %v824_v44, 1  ;;  %v904_v54 = vmul.f32 %v903_v49, %v1806_v52  ;;  %s1420_s22 = sld [smem:[#allocation2 + $0x44]] }
  0x5f   : > { %469 = vrot.lane.b32.xlu1 %v467_v35, %s1592_s13  ;;  %v905_v60 = vmul.f32 %v903_v49, %v838_v59  ;;  %v667_v23 = vsel %vm397_vm0, %v665_v1, %v666_v5  ;;  %v746_v36 = vrot.slane %v742_v15, 1  ;;  %v747_v63 = vrot.slane %v743_v2, 1  ;;  %s1342_s16 = sld [smem:[#allocation2 + $0x14]] }
  0x60   : > { %v364_v51 = vstv %s2023_s20  ;;  %v380_v38 = vstv %s2027_s21  ;;  %v829_v13 = vsel %vm397_vm0, %v827_v11, %v828_v28  ;;  %v908_v56 = vrot.slane %v904_v54, 1  ;;  %s1387_s20 = sld [smem:[#allocation2 + $0x2f]] }
  0x61   : > { %v381_v9 = vmul.f32 %v380_v38, %v362_v46  ;;  %v909_v47 = vrot.slane %v905_v60, 1  ;;  %v365_v59 = vmul.f32 %v364_v51, %v1727_v4  ;;  %v748_v30 = vsel %vm397_vm0, %v746_v36, %v747_v63  ;;  %s1402_s21 = sld [smem:[#allocation2 + $0x38]] }
  0x62   : > { %506 = vrot.lane.b32.xlu0 %v505_v27, %s1592_s13  ;;  %v709_v3 = vstv %s2047_s23  ;;  %v790_v35 = vstv %s1390_s29  ;;  %v984_v22 = vstv %s1423_s8  ;;  %s1417_s23 = sld [smem:[#allocation2 + $0x41]] }
  0x63   : > { %550 = vrot.lane.b32.xlu1 %v548_v10, %s1592_s13  ;;  %v2066_v7 = vadd.f32 %v381_v9, %v365_v59  ;;  %v910_v8 = vsel %vm397_vm0, %v908_v56, %v909_v47  ;;  %v710_v55 = vmul.f32 %v709_v3, %v684_v0  ;;  %v791_v20 = vmul.f32 %v790_v35, %v765_v37  ;;  %s1329_s29 = sld [smem:[#allocation2 + $0xd]] }
  0x64   : > { %v952_v19 = vstv %s1420_s22  ;;  %v871_v27 = vstv %s1405_s9  ;;  %v985_v50 = vmul.f32 %v984_v22, %v1827_v61  ;;  %v986_v10 = vmul.f32 %v984_v22, %v919_v62  ;;  %s1325_s22 = sld [smem:[#allocation2 + $0x9]] }
  0x65   : > { %v953_v57 = vmul.f32 %v952_v19, %v927_v18  ;;  %v872_v0 = vmul.f32 %v871_v27, %v846_v29  ;;  %v372_v48 = vstv %s1312_s15  ;;  %v454_v62 = vstv %s1327_s18  ;;  %s1340_s8 = sld [smem:[#allocation2 + $0x12]] }
  0x66   : > { %387 = vrot.lane.b32.xlu0 %v385_v25, %s1592_s13  ;;  %v989_v18 = vrot.slane %v985_v50, 1  ;;  %v990_v21 = vrot.slane %v986_v10, 1  ;;  %v373_v37 = vmul.f32 %v372_v48, %v1727_v4  ;;  %v455_v34 = vmul.f32 %v454_v62, %v1730_v6  ;;  %s2099_s9 = sld [smem:[#allocation2 + $0x16]] }
  0x67   : > { %631 = vrot.lane.b32.xlu1 %v629_v33, %s1592_s13  ;;  %v535_v29 = vstv %s1342_s16  ;;  %v616_v5 = vstv %s1357_s17  ;;  %v697_v33 = vstv %s1372_s19  ;;  %v444_v22 = vunpack.c.h.bf16 %v2038_v42  ;;  %s2101_s15 = sld [smem:[#allocation2 + $0x1]] }
  0x68   : > { %v991_v40 = vsel %vm397_vm0, %v989_v18, %v990_v21  ;;  %v536_v44 = vmul.f32 %v535_v29, %v1740_v12  ;;  %v617_v2 = vmul.f32 %v616_v5, %v1743_v14  ;;  %v698_v28 = vmul.f32 %v697_v33, %v1760_v24  ;;  %s1326_s17 = sld [smem:[#allocation2 + $0xa]] }
  0x69   : > { %v778_v54 = vstv %s1387_s20  ;;  %v859_v51 = vstv %s1402_s21  ;;  %v940_v47 = vstv %s1417_s23  ;;  %v1593_v10 = vmov 0.0   ;;  %s1355_s19 = sld [smem:[#allocation2 + $0x1b]] }
  0x6a   : > { %668 = vrot.lane.b32.xlu0 %v667_v23, %s1592_s13  ;;  %v779_v63 = vmul.f32 %v778_v54, %v1794_v45  ;;  %v860_v56 = vmul.f32 %v859_v51, %v1806_v52  ;;  %1443 = vmatprep.subr.mxu0 %v1593_v10  ;;  %s2108_s20 = sld [smem:[#allocation2 + $0x1f]] }
  0x6b   : > { %830 = vrot.lane.b32.xlu1 %v829_v13, %s1592_s13  ;;  %1445 = vmatprep.mubr.msk.f32.mxu0 %vm1594_vm1, %v1593_v10  ;;  %s2110_s21 = sld [smem:[#allocation2 + $0x13]] }
  0x6c   : > { %s2116_s23 = sld [smem:[#allocation2 + $0x24]] }
  0x6d   : > { %s2146_s18 = sld [smem:[#allocation2 + $0x36]] }
  0x6e   : > { %749 = vrot.lane.b32.xlu0 %v748_v30, %s1592_s13  ;;  %s2149_s16 = sld [smem:[#allocation2 + $0x37]] }
  0x6f   : > { %911 = vrot.lane.b32.xlu1 %v910_v8, %s1592_s13  ;;  %v941_v8 = vmul.f32 %v940_v47, %v1827_v61 }
  0x72   : > { %712 = vrot.lane.b32.xlu0 %v710_v55, %s1592_s13 }
  0x73   : > { %955 = vrot.lane.b32.xlu1 %v953_v57, %s1592_s13  ;;  %v446_v57 = vstv %s1325_s22  ;;  %s2118_s22 = sld [smem:[#allocation2 + $0x1c]] }
  0x74   : > { %v447_v27 = vmul.f32 %v446_v57, %v1730_v6 }
  0x76   : > { %793 = vrot.lane.b32.xlu0 %v791_v20, %s1592_s13  ;;  %v462_v20 = vstv %s1329_s29  ;;  %s2122_s29 = sld [smem:[#allocation2 + $0x28]] }
  0x77   : > { %v463_v21 = vmul.f32 %v462_v20, %v444_v22 }
  0x7a   : > { %874 = vrot.lane.b32.xlu0 %v872_v0, %s1592_s13  ;;  %v1011_v0 = vld [vmem:[%s2234_s2] sm:$0xff] }
  0x7b   : > { %1444 = vmatpush3.msra.mxu0 %v1011_v0 }
  0x7e   : > { %992 = vrot.lane.b32.xlu0 %v991_v40, %s1592_s13  ;;  %v1339_v40 = vld [vmem:[%s2021_s14 + $0x10] ss:$8 sps:$4 sm:$0xff]  }
  0xa4   : > { %v402_v58 = vpop.permute.xlu0 %401 }
  0xa5   : > { %v404_v43 = vadd.f32 %v402_v58, %v373_v37  ;;  %v527_v37 = vstv %s1340_s8  ;;  %v543_v58 = vstv %s2099_s9  ;;  %s2132_s8 = sld [smem:[#allocation2 + $0x2d]] }
  0xa6   : > { %s2136_s9 = sld [smem:[#allocation2 + $0x31]] }
  0xa7   : > { %v456_v16 = vadd.f32 %v455_v34, %v404_v43  ;;  %v564_v1 = vpop.permute.xlu1 %563  ;;  %v368_v43 = vstv %s2101_s15  ;;  %s2140_s15 = sld [smem:[#allocation2 + $0x2e]] }
  0xa8   : > { %v483_v25 = vpop.permute.xlu0 %482 }
  0xa9   : > { %v485_v49 = vadd.f32 %v483_v25, %v456_v16  ;;  %v528_v16 = vmul.f32 %v527_v37, %v1740_v12  ;;  %v450_v25 = vstv %s1326_s17  ;;  %s2152_s17 = sld [smem:[#allocation2 + $0x3a]] }
  0xaa   : > { %v451_v12 = vmul.f32 %v450_v25, %v437_v41  ;;  %v2248_v41 = vunpack.c.l.bf16 %v1856_v31  ;;  %v851_v25 = vstv %s2146_s18 }
  0xab   : > { %v537_v15 = vadd.f32 %v536_v44, %v485_v49  ;;  %v645_v46 = vpop.permute.xlu1 %644  ;;  %v369_v49 = vmul.f32 %v368_v43, %v357_v17  ;;  %v770_v10 = vstv %s2132_s8  ;;  %s328_s8 = sand.u32 1, %s1580_s25  }
  0xac   : > { %v726_v23 = vpop.permute.xlu0 %725 }
  0xad   : > { %v566_v4 = vadd.f32 %v564_v1, %v537_v15  ;;  %v608_v15 = vstv %s1355_s19  ;;  %s2158_s19 = sld [smem:[#allocation2 + $0x40]] }
  0xae   : > { %v609_v54 = vmul.f32 %v608_v15, %v1743_v14 }
  0xaf   : > { %v618_v11 = vadd.f32 %v617_v2, %v566_v4  ;;  %v807_v9 = vpop.permute.xlu1 %806  ;;  %v606_v4 = vunpack.c.h.bf16 %v1339_v40 }
  0xb0   : > { %v888_v30 = vpop.permute.xlu0 %887 }
  0xb1   : > { %v647_v60 = vadd.f32 %v645_v46, %v618_v11  ;;  %v624_v11 = vstv %s2108_s20  ;;  %s2162_s20 = sld [smem:[#allocation2 + $0x3f]] }
  0xb2   : > { %v625_v53 = vmul.f32 %v624_v11, %v606_v4  ;;  %v2252_v11 = vunpack.c.l.bf16 %v1933_v32 }
  0xb3   : > { %v699_v36 = vadd.f32 %v698_v28, %v647_v60  ;;  %v969_v35 = vpop.permute.xlu1 %968  ;;  %v531_v28 = vstv %s2110_s21  ;;  %s1419_s21 = sld [smem:[#allocation2 + $0x43]] }
  0xb4   : > { %v532_v51 = vmul.f32 %v531_v28, %v2248_v41 }
  0xb5   : > { %v728_v38 = vadd.f32 %v726_v23, %v699_v36  ;;  %v1369_v23 = vld [vmem:[%s2021_s14 + $0x20] ss:$8 sps:$4 sm:$0xff]  }
  0xb7   : > { %v780_v13 = vadd.f32 %v779_v63, %v728_v38  ;;  %v689_v38 = vstv %s2116_s23 }
  0xb9   : > { %v809_v59 = vadd.f32 %v807_v9, %v780_v13 }
  0xbb   : > { %v861_v3 = vadd.f32 %v860_v56, %v809_v59  ;;  %v612_v56 = vstv %s2118_s22  ;;  %v687_v59 = vunpack.c.l.bf16 %v1369_v23 }
  0xbd   : > { %v890_v19 = vadd.f32 %v888_v30, %v861_v3  ;;  %v705_v30 = vstv %s2122_s29  ;;  %v690_v3 = vmul.f32 %v689_v38, %v1760_v24 }
  0xbf   : > { %v942_v55 = vadd.f32 %v941_v8, %v890_v19 }
  0xc1   : > { %v971_v6 = vadd.f32 %v969_v35, %v942_v55  ;;  %v2249_v55 = vunpack.c.h.bf16 %v1856_v31  ;;  %v768_v31 = vunpack.c.h.bf16 %v1369_v23  ;;  %v932_v23 = vstv %s2162_s20 }
  0xc3   : > { %v613_v35 = vmul.f32 %v612_v56, %v2249_v55 }
  0xc9   : > { %v426_v50 = vpop.permute.xlu1 %425 }
  0xca   : > { %v428_v18 = vadd.f32 %v426_v50, %v2066_v7  ;;  %v525_v7 = vunpack.c.l.bf16 %v1339_v40  ;;  %v706_v50 = vmul.f32 %v705_v30, %v687_v59 }
  0xcc   : > { %v448_v42 = vadd.f32 %v447_v27, %v428_v18  ;;  %v544_v5 = vmul.f32 %v543_v58, %v525_v7  ;;  %v1399_v7 = vld [vmem:[%s2021_s14 + $0x30] ss:$8 sps:$4 sm:$0xff]   ;;  %s1424_s14 = sld [smem:[#allocation2 + $0x48]] }
  0xcd   : > { %v588_v29 = vpop.permute.xlu1 %587  ;;  %v849_v15 = vunpack.c.l.bf16 %v1399_v7 }
  0xce   : > { %v464_v48 = vadd.f32 %v463_v21, %v448_v42  ;;  %v2250_v21 = vunpack.c.l.bf16 %v1896_v26  ;;  %v786_v42 = vstv %s2136_s9  ;;  %s1302_s9 = sshll.u32 %s328_s8, 4 }
  0xd0   : > { %v1000_v62 = vpop.permute.xlu0 %999 }
  0xd1   : > { %v1002_v34 = vadd.f32 %v1000_v62, %v971_v6  ;;  %v470_v2 = vpop.permute.xlu1 %469  ;;  %v771_v62 = vmul.f32 %v770_v10, %v1794_v45  ;;  %v1087_v10 = vld [vmem:[%s2233_s1 + $0x8] sm:$0xff] }
  0xd2   : > { %v1008_v32 = vstv %s1424_s14 }
  0xd3   : > { %1004 = vrot.lane.b32.xlu1 %v1002_v34, %s1592_s13  ;;  %s2128_s13 = sld [smem:[#allocation2 + $0x25]] }
  0xd4   : > { %v507_v44 = vpop.permute.xlu0 %506 }
  0xd5   : > { %v509_v1 = vadd.f32 %v507_v44, %v464_v48  ;;  %v551_v13 = vpop.permute.xlu1 %550  ;;  %v774_v48 = vstv %s2140_s15  ;;  %s330_s15 = scalar_lea.vmem [#allocation5], %s1302_s9 }
  0xd6   : > { %s1186_s18 = sshll.u32 %s330_s15, 4  ;;  %s2185_s18 = int_to_ptr.vmem [resolvable:$true] %s1186_s18 }
  0xd7   : > { %v529_v33 = vadd.f32 %v528_v16, %v509_v1  ;;  %v2251_v16 = vunpack.c.h.bf16 %v1896_v26  ;;  %s1524_s14 = scalar_lea.vmem %s2185_s18, 256 }
  0xd8   : > { %v388_v46 = vpop.permute.xlu0 %387  ;;  %p1525_p9 = scmp.ne.s32.totalorder %s2185_s18, %s1524_s14 }
  0xd9   : > { %v545_v60 = vadd.f32 %v544_v5, %v529_v33  ;;  %v390_v17 = vadd.f32 %v388_v46, %v369_v49  ;;  %v693_v22 = vstv %s2128_s13  ;;  %v632_v0 = vpop.permute.xlu1 %631  ;;  %v775_v44 = vmul.f32 %v774_v48, %v2251_v16 }
  0xda   : > { %v694_v6 = vmul.f32 %v693_v22, %v2250_v21  ;;  %v855_v5 = vstv %s2149_s16  ;;  %v867_v33 = vstv %s2152_s17  ;;  %s1437_s16 = sshll.u32 %s1659_s28, 8  ;;  %p1526_p10 = pnand %p1525_p9, %p1676_p5 }
  0xdb   : > { %v590_v36 = vadd.f32 %v588_v29, %v545_v60  ;;  %v452_v63 = vadd.f32 %v451_v12, %v390_v17  ;;  %v787_v29 = vmul.f32 %v786_v42, %v768_v31  ;;  %v852_v12 = vmul.f32 %v851_v25, %v1806_v52  ;;  %s2190_s20 = scalar_lea.hbm %s2239_s7, %s1437_s16  ;;  %s1595_s28 = smov [#allocation5]  }
  0xdc   : > { %v669_v9 = vpop.permute.xlu0 %668  ;;  %v856_v28 = vmul.f32 %v855_v5, %v2252_v11  ;;  %v868_v17 = vmul.f32 %v867_v33, %v849_v15  ;;  %v933_v52 = vmul.f32 %v932_v23, %v1827_v61  ;;  %p1527_p12 = pneg %p1526_p10  ;;  %s1528_s23 = sshll.u32 %s1595_s28, 4  ;;  %s1529_s23 = int_to_ptr.vmem [resolvable:$false] %s1528_s23 }
  0xdd   : > { %v610_v14 = vadd.f32 %v609_v54, %v590_v36  ;;  %v472_v47 = vadd.f32 %v470_v2, %v452_v63  ;;  %v831_v2 = vpop.permute.xlu1 %830  ;;  %v936_v54 = vstv %s2158_s19  ;;  %s1530_s22 = scalar_lea.vmem %s1529_s23, 512  ;;  %p1531_p13 = scmp.lt.s32.totalorder %s2185_s18, %s1529_s23 }
  0xde   : > { %v937_v41 = vmul.f32 %v936_v54, %v923_v39  ;;  %p1532_p0 = scmp.lt.s32.totalorder %s1530_s22, %s1524_s14 }
  0xdf   : > { %v626_v8 = vadd.f32 %v625_v53, %v610_v14  ;;  %v533_v19 = vadd.f32 %v532_v51, %v472_v47  ;;  %v930_v51 = vunpack.c.h.bf16 %v1399_v7 }
  0xe0   : > { %v750_v57 = vpop.permute.xlu0 %749  ;;  %p1533_p1 = por %p1532_p0, %p1531_p13 }
  0xe1   : > { %v671_v20 = vadd.f32 %v669_v9, %v626_v8  ;;  %v553_v27 = vadd.f32 %v551_v13, %v533_v19  ;;  %v912_v38 = vpop.permute.xlu1 %911  ;;  %v948_v9 = vstv %s1419_s21  ;;  %s2192_s21 = scalar_lea.sflag [#allocation3], %s328_s8 }
  0xe2   : > { %v949_v59 = vmul.f32 %v948_v9, %v930_v51  ;;  %p1534_p2 = pnand %p1533_p1, %p1527_p12 }
  0xe3   : > { %v691_v24 = vadd.f32 %v690_v3, %v671_v20  ;;  %v614_v18 = vadd.f32 %v613_v35, %v553_v27  ;;  %v1086_v27 = vld [vmem:[%s2233_s1] sm:$0xff] }
  0xe4   : > { %v713_v40 = vpop.permute.xlu0 %712  ;;  %1450 = vmatprep.mubr.msk.f32.mxu1 %vm1012_vm2, %v1086_v27 }
  0xe5   : > { %v707_v37 = vadd.f32 %v706_v50, %v691_v24  ;;  %v634_v34 = vadd.f32 %v632_v0, %v614_v18  ;;  %v956_v30 = vpop.permute.xlu1 %955 }
  0xe7   : > { %v752_v58 = vadd.f32 %v750_v57, %v707_v37  ;;  %v695_v43 = vadd.f32 %v694_v6, %v634_v34 }
  0xe8   : > { %v794_v1 = vpop.permute.xlu0 %793 }
  0xe9   : > { %v772_v49 = vadd.f32 %v771_v62, %v752_v58  ;;  %v715_v45 = vadd.f32 %v713_v40, %v695_v43 }
  0xeb   : > { %v788_v4 = vadd.f32 %v787_v29, %v772_v49  ;;  %v776_v46 = vadd.f32 %v775_v44, %v715_v45 }
  0xec   : > { %v875_v36 = vpop.permute.xlu0 %874 }
  0xed   : > { %v833_v26 = vadd.f32 %v831_v2, %v788_v4  ;;  %v796_v60 = vadd.f32 %v794_v1, %v776_v46 }
  0xef   : > { %v853_v63 = vadd.f32 %v852_v12, %v833_v26  ;;  %v857_v53 = vadd.f32 %v856_v28, %v796_v60 }
  0xf0   : > { %v993_v8 = vpop.permute.xlu0 %992 }
  0xf1   : > { %v869_v13 = vadd.f32 %v868_v17, %v853_v63  ;;  %v877_v56 = vadd.f32 %v875_v36, %v857_v53 }
  0xf3   : > { %v914_v14 = vadd.f32 %v912_v38, %v869_v13  ;;  %v938_v47 = vadd.f32 %v937_v41, %v877_v56 }
  0xf5   : > { %v934_v3 = vadd.f32 %v933_v52, %v914_v14  ;;  %v958_v19 = vadd.f32 %v956_v30, %v938_v47 }
  0xf7   : > { %v950_v55 = vadd.f32 %v949_v59, %v934_v3 }
  0xf9   : > { %v995_v35 = vadd.f32 %v993_v8, %v950_v55 }
  0xfb   : > { %v997_v57 = vadd.f32 %v995_v35, %v958_v19 }
 0x145   : > { %v1005_v39 = vpop.permute.xlu1 %1004 }
 0x146   : > { %v1007_v22 = vadd.f32 %v1005_v39, %v997_v57 }
 0x148   : > { %v1009_v20 = vadd.f32 %v1008_v32, %v1007_v22 }
 0x14a   : > { %v1010_v61 = vmax.f32 %v1009_v20, 0.0 }
 0x14c   : > { %1446 = vmatmul.mubr.msk.f32.vlgmr.msra.gmra.mxu0 %vm1012_vm2, %v1010_v61 }
 0x20c   : > { %v1082_v50 = vpop.f32.mrf.mxu0 }
 0x20d   : > { %1448 = vmatprep.subr.mxu1 %v1082_v50 }
 0x20e   : > { %v1447_v0 = vpop.f32.mrf.mxu0  ;;  %1449 = vmatpush3.msra.mxu1 %v1082_v50 }
 0x20f   : > { %1451 = vmatmul.mubr.msk.f32.vlgmr.msra.gmra.mxu1 %vm1012_vm2, %v1087_v10 }
 0x2cf   : > { %v1452_v24 = vpop.f32.mrf.mxu1 }
 0x2d0   : > { %1171 = vst.msk [vmem:[%s330_s15 + $0x8] sm:$0xff] %vm1169_vm3, %v1452_v24 }
 0x2d1   : > { %v1160_v18 = vpop.f32.mrf.mxu1 }
 0x2d2   : > { %1170 = vst.msk [vmem:[%s330_s15] sm:$0xff] %vm1169_vm3, %v1160_v18 }
 0x2d3   : > { %1537 = shalt.err (!%p1534_p2)
}
 0x2d4   : > { %s1538_s29 = scalar_lea.hbm %s2190_s20, 256  ;;  %s1542_s9 = scalar_lea.hbm %s2239_s7, 1024 }
 0x2d5   : > { %p1539_p3 = scmp.ne.s32.totalorder %s2190_s20, %s1538_s29  ;;  %p1543_p8 = scmp.lt.s32.totalorder %s2190_s20, %s2239_s7 }
 0x2d6   : > { %p1544_p11 = scmp.lt.s32.totalorder %s1542_s9, %s1538_s29 }
 0x2d7   : > { %p1540_p4 = pnand %p1539_p3, %p1676_p5 }
 0x2d8   : > { %p1545_p9 = por %p1544_p11, %p1543_p8 }
 0x2d9   : > { %p1541_p7 = pneg %p1540_p4 }
 0x2db   : > { %p1546_p10 = pnand %p1545_p9, %p1541_p7 }
 0x2dd   : > { %1549 = shalt.err (!%p1546_p10)
}
 0x2de   : > { %s1596_s17 = smov 128   ;;  %s1597_s19 = smov 8  }
 0x2df   : > { %1457 = dma.vmem_to_hbm [thread:$0]  (%p1676_p5), %s2185_s18, 256, %s2190_s20, %s2192_s21, %s1596_s17, %s1596_s17, %s1597_s19  }
 0x2e0 PF: > { %p1469_p12 = scmp.ge.s32.totalorder %s1588_s27, 2  ;;  %s1201_s14 = sand.u32 1, %s1576_s24  }
 0x2e1   : > { %s1202_s28 = scalar_lea.sflag [#allocation3], %s1201_s14 }
 0x2e2   : > { %p1464_p13 = pnand %p1469_p12, %p1680_p6 }
 0x2e4   : > { %p1465_p0 = pneg %p1464_p13 }
 0x2e6   : > { %1571 = dma.done.wait (%p1465_p0), %s1202_s28, 256  }
 0x2e7   : > { %1573 = vsyncadd (%p1465_p0), %s1202_s28, 4294967040  ;;  %p18_p1 = scmp.ge.s32.totalorder %s1663_s30, 6   ;;  %s2253_s24 = smov %s1580_s25 }
 0x2e8   : > { %s2254_s25 = smov %s1584_s26  ;;  %s2255_s26 = smov %s1674_s10 }
 0x2e9   : > { %s2256_s27 = smov %s1663_s30  ;;  %20 = sbr.rel (!%p18_p1) target bundleno = 4 (0x4), region = 125 }
 0x2ee   :  { %1207 = vsyncpa [#allocation3], 1 }
 0x2ef   :  { %1209 = vsyncpa [#allocation3 + $0x1], 1 }
 0x2f0   :  { %1210 = vsyncpa [#allocation4], 1 }
 0x2f1   :  { %1212 = vsyncpa [#allocation4 + $0x1], 1 }

</bundles_post_ra>
